<compile_context>
chip_gen: v5e
topology: v5e:2x2
jax: 0.10.0
libtpu: 0.0.40
codegen_flags: <defaults>
</compile_context>

<pallas_src>
import functools

import jax
import jax.numpy as jnp
from jax.experimental import pallas as pl
from jax.experimental.pallas import tpu as pltpu

_NEG_SLOPE = 0.2  # assumed slope for cfg.MODEL.DISCRIMINATOR.ACTIVATION


def _round_up(v, m):
    return ((v + m - 1) // m) * m


def _fused_disc_kernel(x_ref, *args, n_layers, neg_slope, height, width):
    """All conv layers for ONE image, entirely in VMEM/vregs.

    x_ref : (1, C0, height*width + 2*n_layers)  channel-major, spatial
            flattened row-major with row stride `width`, zero slack at the end.
    args  : w_0, b_0, ..., w_{L-1}, b_{L-1}, o_ref
        w_l   : (Cout_l, 9*Cin_l)   im2col-packed 3x3 weights
        b_l   : (Cout_l, 1)
        o_ref : (1, Cout_last, (height - 2*n_layers) * width)
    """
    o_ref = args[-1]
    wb = args[:-1]

    x = x_ref[0].astype(jnp.float32)          # (C0, height*width + slack)
    h_cur = height
    slack = 2 * n_layers

    for layer in range(n_layers):
        w2 = wb[2 * layer][...]               # (cout, 9*cin)
        b = wb[2 * layer + 1][...]            # (cout, 1)
        h_cur -= 2
        slack -= 2
        p_out = h_cur * width + slack

        # im2col: the 9 taps are contiguous lane slices (row stride stays
        # `width`); sublane-aligned concat builds the (9*cin, p_out) matrix.
        taps = [
            x[:, ky * width + kx: ky * width + kx + p_out]
            for ky in range(3) for kx in range(3)
        ]
        patches = jnp.concatenate(taps, axis=0)          # (9*cin, p_out)

        # One K=9*Cin MXU matmul per layer, f32 accumulation.
        y = jnp.dot(w2, patches, preferred_element_type=jnp.float32) + b

        if layer < n_layers - 1:                          # LeakyReLU on all but last
            y = jnp.where(y >= 0, y, neg_slope * y)
        if 1 <= layer < n_layers - 1:                     # residual blocks 1..5
            # center-cropped identity == same flattened layout shifted by W+1
            y = y + x[:, width + 1: width + 1 + p_out]

        x = y

    o_ref[0] = x.astype(o_ref.dtype)                      # (cout_last, hf*width)


def pack_conv_weight(w_oihw, cin_total=None):
    """(Cout, Cin, 3, 3) torch layout -> (Cout, 9*cin_total) im2col layout.

    Zero-pads unused input channels, which folds the x[:, :input_channel]
    channel slice of the module into the first layer's weights."""
    cout, cin, kh, kw = w_oihw.shape
    cin_total = cin if cin_total is None else cin_total
    wt = jnp.transpose(w_oihw, (0, 2, 3, 1))             # (Cout, kh, kw, Cin)
    if cin_total != cin:
        wt = jnp.pad(wt, ((0, 0), (0, 0), (0, 0), (0, cin_total - cin)))
    return wt.reshape(cout, kh * kw * cin_total)


def pack_params(params, x_channels_padded):
    """params: list of (w (Cout,Cin,3,3), b (Cout,)) torch-layout tensors."""
    packed = []
    for idx, (wgt, b) in enumerate(params):
        cin_total = x_channels_padded if idx == 0 else None
        packed.append((pack_conv_weight(wgt, cin_total), b.reshape(-1, 1)))
    return packed


def residual_discriminator_wo_padding(x_nchw, packed_params):
    """Fused forward pass: a single pallas_call, grid over batch only."""
    n, c0, h, w = x_nchw.shape
    n_layers = len(packed_params)
    cout_last = packed_params[-1][0].shape[0]
    c0_pad = packed_params[0][0].shape[1] // 9           # padded input channels
    hf, wf = h - 2 * n_layers, w - 2 * n_layers
    slack = 2 * n_layers

    # Flatten spatial (row-major, stride = w), pad channels to c0_pad and add
    # `slack` zero lanes so the kernel's full-width conv trick never reads out
    # of bounds.  Trivially cheap / fused by XLA; all real work is in the kernel.
    x_flat = jnp.pad(x_nchw.reshape(n, c0, h * w),
                     ((0, 0), (0, c0_pad - c0), (0, slack)))

    flat_wb = []
    in_specs = [pl.BlockSpec((1, c0_pad, h * w + slack), lambda i: (i, 0, 0))]
    for w2, b in packed_params:
        flat_wb += [w2, b]
        in_specs.append(pl.BlockSpec(w2.shape, lambda i: (0, 0)))
        in_specs.append(pl.BlockSpec(b.shape, lambda i: (0, 0)))

    kernel = functools.partial(
        _fused_disc_kernel,
        n_layers=n_layers, neg_slope=_NEG_SLOPE, height=h, width=w)

    out_flat = pl.pallas_call(
        kernel,
        out_shape=jax.ShapeDtypeStruct((n, cout_last, hf * w), jnp.float32),
        grid=(n,),
        in_specs=in_specs,
        out_specs=pl.BlockSpec((1, cout_last, hf * w), lambda i: (i, 0, 0)),
        compiler_params=pltpu.CompilerParams(
            dimension_semantics=("parallel",)),   # batch -> 2 TCs on v7x
    )(x_flat, *flat_wb)

    # Drop the garbage "wrap" columns: valid output is the first wf columns of
    # each stride-w row.  (Cheap XLA reshape+slice on a few hundred bytes.)
    return out_flat.reshape(n, cout_last, hf, w)[:, :, :, :wf]


def init_params(key, input_channel, feat, output_channel, num_res_layers=5):
    """Deterministic synthetic parameters in PyTorch (Cout, Cin, kh, kw) layout."""
    dims = ([(input_channel, feat)] + [(feat, feat)] * num_res_layers
            + [(feat, output_channel)])
    params = []
    for cin, cout in dims:
        key, k_w, k_b = jax.random.split(key, 3)
        scale = 1.0 / jnp.sqrt(jnp.float32(cin * 9))
        wgt = jax.random.normal(k_w, (cout, cin, 3, 3), jnp.float32) * scale
        b = jax.random.normal(k_b, (cout,), jnp.float32) * 0.01
        params.append((wgt, b))
    return params


def _reference_forward(x, params, input_channel):
    """Pure-JAX/XLA reference with the same assumed block semantics."""
    h = x[:, :input_channel]
    n_layers = len(params)
    for idx, (wgt, b) in enumerate(params):
        y = jax.lax.conv_general_dilated(
            h, wgt, window_strides=(1, 1), padding="VALID",
            dimension_numbers=("NCHW", "OIHW", "NCHW"),
            precision=jax.lax.Precision.HIGHEST)
        y = y + b.reshape(1, -1, 1, 1)
        if idx < n_layers - 1:
            y = jnp.where(y >= 0, y, _NEG_SLOPE * y)
        if 1 <= idx < n_layers - 1:
            y = y + h[:, :, 1:-1, 1:-1]
        h = y
    return h


if __name__ == "__main__":
    # Synthetic cfg: INPUT_CHANNEL=3, HIDDEN_CHANNEL=16, len(DOWN_RATIOS)=2.
    input_channel = 3
    feat = 16
    output_channel = 2

    key = jax.random.PRNGKey(0)
    k_params, k_x = jax.random.split(key)
    params = init_params(k_params, input_channel, feat, output_channel)

    # NCHW input with 4 channels; forward uses only the first 3 (folded into
    # the packed layer-0 weights).  7 valid 3x3 convs shrink spatial 20 -> 6.
    x = jax.random.normal(k_x, (2, 4, 20, 20), jnp.float32)

    packed = pack_params(params, _round_up(x.shape[1], 8))
    fwd = jax.jit(residual_discriminator_wo_padding)
    out = jax.block_until_ready(fwd(x, packed))

    assert out.shape == (2, output_channel, 6, 6), out.shape
    assert bool(jnp.all(jnp.isfinite(out)))

    # correctness vs a pure-XLA reference of the same (assumed) architecture
    ref = _reference_forward(x, params, input_channel)
    rel_err = float(jnp.linalg.norm(out - ref) / (jnp.linalg.norm(ref) + 1e-12))
    assert rel_err < 5e-2, rel_err

    print("KERNEL_OK")
</pallas_src>

<mosaic_0001>
module attributes {stable_mosaic.version = 11 : i64} {
  func.func @_fused_disc_kernel(%arg0: i32, %arg1: memref<1x8x414xf32, #tpu.memory_space<vmem>>, %arg2: memref<16x72xf32, #tpu.memory_space<vmem>>, %arg3: memref<16x1xf32, #tpu.memory_space<vmem>>, %arg4: memref<16x144xf32, #tpu.memory_space<vmem>>, %arg5: memref<16x1xf32, #tpu.memory_space<vmem>>, %arg6: memref<16x144xf32, #tpu.memory_space<vmem>>, %arg7: memref<16x1xf32, #tpu.memory_space<vmem>>, %arg8: memref<16x144xf32, #tpu.memory_space<vmem>>, %arg9: memref<16x1xf32, #tpu.memory_space<vmem>>, %arg10: memref<16x144xf32, #tpu.memory_space<vmem>>, %arg11: memref<16x1xf32, #tpu.memory_space<vmem>>, %arg12: memref<16x144xf32, #tpu.memory_space<vmem>>, %arg13: memref<16x1xf32, #tpu.memory_space<vmem>>, %arg14: memref<2x144xf32, #tpu.memory_space<vmem>>, %arg15: memref<2x1xf32, #tpu.memory_space<vmem>>, %arg16: memref<1x2x120xf32, #tpu.memory_space<vmem>>) attributes {dimension_semantics = [#tpu.dimension_semantics<parallel>], iteration_bounds = array<i64: 2>, scalar_prefetch = 0 : i64, scratch_operands = 0 : i64, tpu.core_type = #tpu.core_type<tc>, window_params = [{transform_indices = @transform_0, window_bounds = array<i64: 1, 8, 414>}, {pipeline_mode = #tpu.pipeline_mode<synchronous>, transform_indices = @transform_1, window_bounds = array<i64: 16, 72>}, {pipeline_mode = #tpu.pipeline_mode<synchronous>, transform_indices = @transform_2, window_bounds = array<i64: 16, 1>}, {pipeline_mode = #tpu.pipeline_mode<synchronous>, transform_indices = @transform_3, window_bounds = array<i64: 16, 144>}, {pipeline_mode = #tpu.pipeline_mode<synchronous>, transform_indices = @transform_4, window_bounds = array<i64: 16, 1>}, {pipeline_mode = #tpu.pipeline_mode<synchronous>, transform_indices = @transform_5, window_bounds = array<i64: 16, 144>}, {pipeline_mode = #tpu.pipeline_mode<synchronous>, transform_indices = @transform_6, window_bounds = array<i64: 16, 1>}, {pipeline_mode = #tpu.pipeline_mode<synchronous>, transform_indices = @transform_7, window_bounds = array<i64: 16, 144>}, {pipeline_mode = #tpu.pipeline_mode<synchronous>, transform_indices = @transform_8, window_bounds = array<i64: 16, 1>}, {pipeline_mode = #tpu.pipeline_mode<synchronous>, transform_indices = @transform_9, window_bounds = array<i64: 16, 144>}, {pipeline_mode = #tpu.pipeline_mode<synchronous>, transform_indices = @transform_10, window_bounds = array<i64: 16, 1>}, {pipeline_mode = #tpu.pipeline_mode<synchronous>, transform_indices = @transform_11, window_bounds = array<i64: 16, 144>}, {pipeline_mode = #tpu.pipeline_mode<synchronous>, transform_indices = @transform_12, window_bounds = array<i64: 16, 1>}, {pipeline_mode = #tpu.pipeline_mode<synchronous>, transform_indices = @transform_13, window_bounds = array<i64: 2, 144>}, {pipeline_mode = #tpu.pipeline_mode<synchronous>, transform_indices = @transform_14, window_bounds = array<i64: 2, 1>}, {transform_indices = @transform_15, window_bounds = array<i64: 1, 2, 120>}]} {
    %c0 = arith.constant 0 : index
    %c0_0 = arith.constant 0 : index
    %c0_1 = arith.constant 0 : index
    %0 = vector.load %arg1[%c0, %c0_0, %c0_1] : memref<1x8x414xf32, #tpu.memory_space<vmem>>, vector<1x8x414xf32>
    %1 = vector.shape_cast %0 : vector<1x8x414xf32> to vector<8x414xf32>
    %c0_2 = arith.constant 0 : index
    %c0_3 = arith.constant 0 : index
    %2 = vector.load %arg2[%c0_2, %c0_3] : memref<16x72xf32, #tpu.memory_space<vmem>>, vector<16x72xf32>
    %c0_4 = arith.constant 0 : index
    %c0_5 = arith.constant 0 : index
    %3 = vector.load %arg3[%c0_4, %c0_5] : memref<16x1xf32, #tpu.memory_space<vmem>>, vector<16x1xf32>
    %4 = vector.extract_strided_slice %1 {offsets = [0, 0], sizes = [8, 372], strides = [1, 1]} : vector<8x414xf32> to vector<8x372xf32>
    %5 = vector.extract_strided_slice %1 {offsets = [0, 1], sizes = [8, 372], strides = [1, 1]} : vector<8x414xf32> to vector<8x372xf32>
    %6 = vector.extract_strided_slice %1 {offsets = [0, 2], sizes = [8, 372], strides = [1, 1]} : vector<8x414xf32> to vector<8x372xf32>
    %7 = vector.extract_strided_slice %1 {offsets = [0, 20], sizes = [8, 372], strides = [1, 1]} : vector<8x414xf32> to vector<8x372xf32>
    %8 = vector.extract_strided_slice %1 {offsets = [0, 21], sizes = [8, 372], strides = [1, 1]} : vector<8x414xf32> to vector<8x372xf32>
    %9 = vector.extract_strided_slice %1 {offsets = [0, 22], sizes = [8, 372], strides = [1, 1]} : vector<8x414xf32> to vector<8x372xf32>
    %10 = vector.extract_strided_slice %1 {offsets = [0, 40], sizes = [8, 372], strides = [1, 1]} : vector<8x414xf32> to vector<8x372xf32>
    %11 = vector.extract_strided_slice %1 {offsets = [0, 41], sizes = [8, 372], strides = [1, 1]} : vector<8x414xf32> to vector<8x372xf32>
    %12 = vector.extract_strided_slice %1 {offsets = [0, 42], sizes = [8, 372], strides = [1, 1]} : vector<8x414xf32> to vector<8x372xf32>
    %13 = tpu.concatenate %4, %5, %6, %7, %8, %9, %10, %11, %12 in 0 : vector<8x372xf32>, vector<8x372xf32>, vector<8x372xf32>, vector<8x372xf32>, vector<8x372xf32>, vector<8x372xf32>, vector<8x372xf32>, vector<8x372xf32>, vector<8x372xf32> -> vector<72x372xf32>
    %cst = arith.constant dense<0.000000e+00> : vector<16x372xf32>
    %14 = tpu.matmul %2, %13, %cst {dimension_numbers = #tpu.dot_dimension_numbers<[1], [0], [0], [1], [0, 0, 1, 1], [], []>} : vector<16x72xf32>, vector<72x372xf32>, vector<16x372xf32> -> vector<16x372xf32>
    %15 = vector.broadcast %3 : vector<16x1xf32> to vector<16x372xf32>
    %16 = arith.addf %14, %15 : vector<16x372xf32>
    %cst_6 = arith.constant 0.000000e+00 : f32
    %17 = vector.broadcast %cst_6 : f32 to vector<16x372xf32>
    %18 = arith.cmpf oge, %16, %17 : vector<16x372xf32>
    %cst_7 = arith.constant 2.000000e-01 : f32
    %19 = vector.broadcast %cst_7 : f32 to vector<16x372xf32>
    %20 = arith.mulf %19, %16 : vector<16x372xf32>
    %21 = arith.select %18, %16, %20 : vector<16x372xi1>, vector<16x372xf32>
    %c0_8 = arith.constant 0 : index
    %c0_9 = arith.constant 0 : index
    %22 = vector.load %arg4[%c0_8, %c0_9] : memref<16x144xf32, #tpu.memory_space<vmem>>, vector<16x144xf32>
    %c0_10 = arith.constant 0 : index
    %c0_11 = arith.constant 0 : index
    %23 = vector.load %arg5[%c0_10, %c0_11] : memref<16x1xf32, #tpu.memory_space<vmem>>, vector<16x1xf32>
    %24 = vector.extract_strided_slice %21 {offsets = [0, 0], sizes = [16, 330], strides = [1, 1]} : vector<16x372xf32> to vector<16x330xf32>
    %25 = vector.extract_strided_slice %21 {offsets = [0, 1], sizes = [16, 330], strides = [1, 1]} : vector<16x372xf32> to vector<16x330xf32>
    %26 = vector.extract_strided_slice %21 {offsets = [0, 2], sizes = [16, 330], strides = [1, 1]} : vector<16x372xf32> to vector<16x330xf32>
    %27 = vector.extract_strided_slice %21 {offsets = [0, 20], sizes = [16, 330], strides = [1, 1]} : vector<16x372xf32> to vector<16x330xf32>
    %28 = vector.extract_strided_slice %21 {offsets = [0, 21], sizes = [16, 330], strides = [1, 1]} : vector<16x372xf32> to vector<16x330xf32>
    %29 = vector.extract_strided_slice %21 {offsets = [0, 22], sizes = [16, 330], strides = [1, 1]} : vector<16x372xf32> to vector<16x330xf32>
    %30 = vector.extract_strided_slice %21 {offsets = [0, 40], sizes = [16, 330], strides = [1, 1]} : vector<16x372xf32> to vector<16x330xf32>
    %31 = vector.extract_strided_slice %21 {offsets = [0, 41], sizes = [16, 330], strides = [1, 1]} : vector<16x372xf32> to vector<16x330xf32>
    %32 = vector.extract_strided_slice %21 {offsets = [0, 42], sizes = [16, 330], strides = [1, 1]} : vector<16x372xf32> to vector<16x330xf32>
    %33 = tpu.concatenate %24, %25, %26, %27, %28, %29, %30, %31, %32 in 0 : vector<16x330xf32>, vector<16x330xf32>, vector<16x330xf32>, vector<16x330xf32>, vector<16x330xf32>, vector<16x330xf32>, vector<16x330xf32>, vector<16x330xf32>, vector<16x330xf32> -> vector<144x330xf32>
    %cst_12 = arith.constant dense<0.000000e+00> : vector<16x330xf32>
    %34 = tpu.matmul %22, %33, %cst_12 {dimension_numbers = #tpu.dot_dimension_numbers<[1], [0], [0], [1], [0, 0, 1, 1], [], []>} : vector<16x144xf32>, vector<144x330xf32>, vector<16x330xf32> -> vector<16x330xf32>
    %35 = vector.broadcast %23 : vector<16x1xf32> to vector<16x330xf32>
    %36 = arith.addf %34, %35 : vector<16x330xf32>
    %cst_13 = arith.constant 0.000000e+00 : f32
    %37 = vector.broadcast %cst_13 : f32 to vector<16x330xf32>
    %38 = arith.cmpf oge, %36, %37 : vector<16x330xf32>
    %cst_14 = arith.constant 2.000000e-01 : f32
    %39 = vector.broadcast %cst_14 : f32 to vector<16x330xf32>
    %40 = arith.mulf %39, %36 : vector<16x330xf32>
    %41 = arith.select %38, %36, %40 : vector<16x330xi1>, vector<16x330xf32>
    %42 = vector.extract_strided_slice %21 {offsets = [0, 21], sizes = [16, 330], strides = [1, 1]} : vector<16x372xf32> to vector<16x330xf32>
    %43 = arith.addf %41, %42 : vector<16x330xf32>
    %c0_15 = arith.constant 0 : index
    %c0_16 = arith.constant 0 : index
    %44 = vector.load %arg6[%c0_15, %c0_16] : memref<16x144xf32, #tpu.memory_space<vmem>>, vector<16x144xf32>
    %c0_17 = arith.constant 0 : index
    %c0_18 = arith.constant 0 : index
    %45 = vector.load %arg7[%c0_17, %c0_18] : memref<16x1xf32, #tpu.memory_space<vmem>>, vector<16x1xf32>
    %46 = vector.extract_strided_slice %43 {offsets = [0, 0], sizes = [16, 288], strides = [1, 1]} : vector<16x330xf32> to vector<16x288xf32>
    %47 = vector.extract_strided_slice %43 {offsets = [0, 1], sizes = [16, 288], strides = [1, 1]} : vector<16x330xf32> to vector<16x288xf32>
    %48 = vector.extract_strided_slice %43 {offsets = [0, 2], sizes = [16, 288], strides = [1, 1]} : vector<16x330xf32> to vector<16x288xf32>
    %49 = vector.extract_strided_slice %43 {offsets = [0, 20], sizes = [16, 288], strides = [1, 1]} : vector<16x330xf32> to vector<16x288xf32>
    %50 = vector.extract_strided_slice %43 {offsets = [0, 21], sizes = [16, 288], strides = [1, 1]} : vector<16x330xf32> to vector<16x288xf32>
    %51 = vector.extract_strided_slice %43 {offsets = [0, 22], sizes = [16, 288], strides = [1, 1]} : vector<16x330xf32> to vector<16x288xf32>
    %52 = vector.extract_strided_slice %43 {offsets = [0, 40], sizes = [16, 288], strides = [1, 1]} : vector<16x330xf32> to vector<16x288xf32>
    %53 = vector.extract_strided_slice %43 {offsets = [0, 41], sizes = [16, 288], strides = [1, 1]} : vector<16x330xf32> to vector<16x288xf32>
    %54 = vector.extract_strided_slice %43 {offsets = [0, 42], sizes = [16, 288], strides = [1, 1]} : vector<16x330xf32> to vector<16x288xf32>
    %55 = tpu.concatenate %46, %47, %48, %49, %50, %51, %52, %53, %54 in 0 : vector<16x288xf32>, vector<16x288xf32>, vector<16x288xf32>, vector<16x288xf32>, vector<16x288xf32>, vector<16x288xf32>, vector<16x288xf32>, vector<16x288xf32>, vector<16x288xf32> -> vector<144x288xf32>
    %cst_19 = arith.constant dense<0.000000e+00> : vector<16x288xf32>
    %56 = tpu.matmul %44, %55, %cst_19 {dimension_numbers = #tpu.dot_dimension_numbers<[1], [0], [0], [1], [0, 0, 1, 1], [], []>} : vector<16x144xf32>, vector<144x288xf32>, vector<16x288xf32> -> vector<16x288xf32>
    %57 = vector.broadcast %45 : vector<16x1xf32> to vector<16x288xf32>
    %58 = arith.addf %56, %57 : vector<16x288xf32>
    %cst_20 = arith.constant 0.000000e+00 : f32
    %59 = vector.broadcast %cst_20 : f32 to vector<16x288xf32>
    %60 = arith.cmpf oge, %58, %59 : vector<16x288xf32>
    %cst_21 = arith.constant 2.000000e-01 : f32
    %61 = vector.broadcast %cst_21 : f32 to vector<16x288xf32>
    %62 = arith.mulf %61, %58 : vector<16x288xf32>
    %63 = arith.select %60, %58, %62 : vector<16x288xi1>, vector<16x288xf32>
    %64 = vector.extract_strided_slice %43 {offsets = [0, 21], sizes = [16, 288], strides = [1, 1]} : vector<16x330xf32> to vector<16x288xf32>
    %65 = arith.addf %63, %64 : vector<16x288xf32>
    %c0_22 = arith.constant 0 : index
    %c0_23 = arith.constant 0 : index
    %66 = vector.load %arg8[%c0_22, %c0_23] : memref<16x144xf32, #tpu.memory_space<vmem>>, vector<16x144xf32>
    %c0_24 = arith.constant 0 : index
    %c0_25 = arith.constant 0 : index
    %67 = vector.load %arg9[%c0_24, %c0_25] : memref<16x1xf32, #tpu.memory_space<vmem>>, vector<16x1xf32>
    %68 = vector.extract_strided_slice %65 {offsets = [0, 0], sizes = [16, 246], strides = [1, 1]} : vector<16x288xf32> to vector<16x246xf32>
    %69 = vector.extract_strided_slice %65 {offsets = [0, 1], sizes = [16, 246], strides = [1, 1]} : vector<16x288xf32> to vector<16x246xf32>
    %70 = vector.extract_strided_slice %65 {offsets = [0, 2], sizes = [16, 246], strides = [1, 1]} : vector<16x288xf32> to vector<16x246xf32>
    %71 = vector.extract_strided_slice %65 {offsets = [0, 20], sizes = [16, 246], strides = [1, 1]} : vector<16x288xf32> to vector<16x246xf32>
    %72 = vector.extract_strided_slice %65 {offsets = [0, 21], sizes = [16, 246], strides = [1, 1]} : vector<16x288xf32> to vector<16x246xf32>
    %73 = vector.extract_strided_slice %65 {offsets = [0, 22], sizes = [16, 246], strides = [1, 1]} : vector<16x288xf32> to vector<16x246xf32>
    %74 = vector.extract_strided_slice %65 {offsets = [0, 40], sizes = [16, 246], strides = [1, 1]} : vector<16x288xf32> to vector<16x246xf32>
    %75 = vector.extract_strided_slice %65 {offsets = [0, 41], sizes = [16, 246], strides = [1, 1]} : vector<16x288xf32> to vector<16x246xf32>
    %76 = vector.extract_strided_slice %65 {offsets = [0, 42], sizes = [16, 246], strides = [1, 1]} : vector<16x288xf32> to vector<16x246xf32>
    %77 = tpu.concatenate %68, %69, %70, %71, %72, %73, %74, %75, %76 in 0 : vector<16x246xf32>, vector<16x246xf32>, vector<16x246xf32>, vector<16x246xf32>, vector<16x246xf32>, vector<16x246xf32>, vector<16x246xf32>, vector<16x246xf32>, vector<16x246xf32> -> vector<144x246xf32>
    %cst_26 = arith.constant dense<0.000000e+00> : vector<16x246xf32>
    %78 = tpu.matmul %66, %77, %cst_26 {dimension_numbers = #tpu.dot_dimension_numbers<[1], [0], [0], [1], [0, 0, 1, 1], [], []>} : vector<16x144xf32>, vector<144x246xf32>, vector<16x246xf32> -> vector<16x246xf32>
    %79 = vector.broadcast %67 : vector<16x1xf32> to vector<16x246xf32>
    %80 = arith.addf %78, %79 : vector<16x246xf32>
    %cst_27 = arith.constant 0.000000e+00 : f32
    %81 = vector.broadcast %cst_27 : f32 to vector<16x246xf32>
    %82 = arith.cmpf oge, %80, %81 : vector<16x246xf32>
    %cst_28 = arith.constant 2.000000e-01 : f32
    %83 = vector.broadcast %cst_28 : f32 to vector<16x246xf32>
    %84 = arith.mulf %83, %80 : vector<16x246xf32>
    %85 = arith.select %82, %80, %84 : vector<16x246xi1>, vector<16x246xf32>
    %86 = vector.extract_strided_slice %65 {offsets = [0, 21], sizes = [16, 246], strides = [1, 1]} : vector<16x288xf32> to vector<16x246xf32>
    %87 = arith.addf %85, %86 : vector<16x246xf32>
    %c0_29 = arith.constant 0 : index
    %c0_30 = arith.constant 0 : index
    %88 = vector.load %arg10[%c0_29, %c0_30] : memref<16x144xf32, #tpu.memory_space<vmem>>, vector<16x144xf32>
    %c0_31 = arith.constant 0 : index
    %c0_32 = arith.constant 0 : index
    %89 = vector.load %arg11[%c0_31, %c0_32] : memref<16x1xf32, #tpu.memory_space<vmem>>, vector<16x1xf32>
    %90 = vector.extract_strided_slice %87 {offsets = [0, 0], sizes = [16, 204], strides = [1, 1]} : vector<16x246xf32> to vector<16x204xf32>
    %91 = vector.extract_strided_slice %87 {offsets = [0, 1], sizes = [16, 204], strides = [1, 1]} : vector<16x246xf32> to vector<16x204xf32>
    %92 = vector.extract_strided_slice %87 {offsets = [0, 2], sizes = [16, 204], strides = [1, 1]} : vector<16x246xf32> to vector<16x204xf32>
    %93 = vector.extract_strided_slice %87 {offsets = [0, 20], sizes = [16, 204], strides = [1, 1]} : vector<16x246xf32> to vector<16x204xf32>
    %94 = vector.extract_strided_slice %87 {offsets = [0, 21], sizes = [16, 204], strides = [1, 1]} : vector<16x246xf32> to vector<16x204xf32>
    %95 = vector.extract_strided_slice %87 {offsets = [0, 22], sizes = [16, 204], strides = [1, 1]} : vector<16x246xf32> to vector<16x204xf32>
    %96 = vector.extract_strided_slice %87 {offsets = [0, 40], sizes = [16, 204], strides = [1, 1]} : vector<16x246xf32> to vector<16x204xf32>
    %97 = vector.extract_strided_slice %87 {offsets = [0, 41], sizes = [16, 204], strides = [1, 1]} : vector<16x246xf32> to vector<16x204xf32>
    %98 = vector.extract_strided_slice %87 {offsets = [0, 42], sizes = [16, 204], strides = [1, 1]} : vector<16x246xf32> to vector<16x204xf32>
    %99 = tpu.concatenate %90, %91, %92, %93, %94, %95, %96, %97, %98 in 0 : vector<16x204xf32>, vector<16x204xf32>, vector<16x204xf32>, vector<16x204xf32>, vector<16x204xf32>, vector<16x204xf32>, vector<16x204xf32>, vector<16x204xf32>, vector<16x204xf32> -> vector<144x204xf32>
    %cst_33 = arith.constant dense<0.000000e+00> : vector<16x204xf32>
    %100 = tpu.matmul %88, %99, %cst_33 {dimension_numbers = #tpu.dot_dimension_numbers<[1], [0], [0], [1], [0, 0, 1, 1], [], []>} : vector<16x144xf32>, vector<144x204xf32>, vector<16x204xf32> -> vector<16x204xf32>
    %101 = vector.broadcast %89 : vector<16x1xf32> to vector<16x204xf32>
    %102 = arith.addf %100, %101 : vector<16x204xf32>
    %cst_34 = arith.constant 0.000000e+00 : f32
    %103 = vector.broadcast %cst_34 : f32 to vector<16x204xf32>
    %104 = arith.cmpf oge, %102, %103 : vector<16x204xf32>
    %cst_35 = arith.constant 2.000000e-01 : f32
    %105 = vector.broadcast %cst_35 : f32 to vector<16x204xf32>
    %106 = arith.mulf %105, %102 : vector<16x204xf32>
    %107 = arith.select %104, %102, %106 : vector<16x204xi1>, vector<16x204xf32>
    %108 = vector.extract_strided_slice %87 {offsets = [0, 21], sizes = [16, 204], strides = [1, 1]} : vector<16x246xf32> to vector<16x204xf32>
    %109 = arith.addf %107, %108 : vector<16x204xf32>
    %c0_36 = arith.constant 0 : index
    %c0_37 = arith.constant 0 : index
    %110 = vector.load %arg12[%c0_36, %c0_37] : memref<16x144xf32, #tpu.memory_space<vmem>>, vector<16x144xf32>
    %c0_38 = arith.constant 0 : index
    %c0_39 = arith.constant 0 : index
    %111 = vector.load %arg13[%c0_38, %c0_39] : memref<16x1xf32, #tpu.memory_space<vmem>>, vector<16x1xf32>
    %112 = vector.extract_strided_slice %109 {offsets = [0, 0], sizes = [16, 162], strides = [1, 1]} : vector<16x204xf32> to vector<16x162xf32>
    %113 = vector.extract_strided_slice %109 {offsets = [0, 1], sizes = [16, 162], strides = [1, 1]} : vector<16x204xf32> to vector<16x162xf32>
    %114 = vector.extract_strided_slice %109 {offsets = [0, 2], sizes = [16, 162], strides = [1, 1]} : vector<16x204xf32> to vector<16x162xf32>
    %115 = vector.extract_strided_slice %109 {offsets = [0, 20], sizes = [16, 162], strides = [1, 1]} : vector<16x204xf32> to vector<16x162xf32>
    %116 = vector.extract_strided_slice %109 {offsets = [0, 21], sizes = [16, 162], strides = [1, 1]} : vector<16x204xf32> to vector<16x162xf32>
    %117 = vector.extract_strided_slice %109 {offsets = [0, 22], sizes = [16, 162], strides = [1, 1]} : vector<16x204xf32> to vector<16x162xf32>
    %118 = vector.extract_strided_slice %109 {offsets = [0, 40], sizes = [16, 162], strides = [1, 1]} : vector<16x204xf32> to vector<16x162xf32>
    %119 = vector.extract_strided_slice %109 {offsets = [0, 41], sizes = [16, 162], strides = [1, 1]} : vector<16x204xf32> to vector<16x162xf32>
    %120 = vector.extract_strided_slice %109 {offsets = [0, 42], sizes = [16, 162], strides = [1, 1]} : vector<16x204xf32> to vector<16x162xf32>
    %121 = tpu.concatenate %112, %113, %114, %115, %116, %117, %118, %119, %120 in 0 : vector<16x162xf32>, vector<16x162xf32>, vector<16x162xf32>, vector<16x162xf32>, vector<16x162xf32>, vector<16x162xf32>, vector<16x162xf32>, vector<16x162xf32>, vector<16x162xf32> -> vector<144x162xf32>
    %cst_40 = arith.constant dense<0.000000e+00> : vector<16x162xf32>
    %122 = tpu.matmul %110, %121, %cst_40 {dimension_numbers = #tpu.dot_dimension_numbers<[1], [0], [0], [1], [0, 0, 1, 1], [], []>} : vector<16x144xf32>, vector<144x162xf32>, vector<16x162xf32> -> vector<16x162xf32>
    %123 = vector.broadcast %111 : vector<16x1xf32> to vector<16x162xf32>
    %124 = arith.addf %122, %123 : vector<16x162xf32>
    %cst_41 = arith.constant 0.000000e+00 : f32
    %125 = vector.broadcast %cst_41 : f32 to vector<16x162xf32>
    %126 = arith.cmpf oge, %124, %125 : vector<16x162xf32>
    %cst_42 = arith.constant 2.000000e-01 : f32
    %127 = vector.broadcast %cst_42 : f32 to vector<16x162xf32>
    %128 = arith.mulf %127, %124 : vector<16x162xf32>
    %129 = arith.select %126, %124, %128 : vector<16x162xi1>, vector<16x162xf32>
    %130 = vector.extract_strided_slice %109 {offsets = [0, 21], sizes = [16, 162], strides = [1, 1]} : vector<16x204xf32> to vector<16x162xf32>
    %131 = arith.addf %129, %130 : vector<16x162xf32>
    %c0_43 = arith.constant 0 : index
    %c0_44 = arith.constant 0 : index
    %132 = vector.load %arg14[%c0_43, %c0_44] : memref<2x144xf32, #tpu.memory_space<vmem>>, vector<2x144xf32>
    %c0_45 = arith.constant 0 : index
    %c0_46 = arith.constant 0 : index
    %133 = vector.load %arg15[%c0_45, %c0_46] : memref<2x1xf32, #tpu.memory_space<vmem>>, vector<2x1xf32>
    %134 = vector.extract_strided_slice %131 {offsets = [0, 0], sizes = [16, 120], strides = [1, 1]} : vector<16x162xf32> to vector<16x120xf32>
    %135 = vector.extract_strided_slice %131 {offsets = [0, 1], sizes = [16, 120], strides = [1, 1]} : vector<16x162xf32> to vector<16x120xf32>
    %136 = vector.extract_strided_slice %131 {offsets = [0, 2], sizes = [16, 120], strides = [1, 1]} : vector<16x162xf32> to vector<16x120xf32>
    %137 = vector.extract_strided_slice %131 {offsets = [0, 20], sizes = [16, 120], strides = [1, 1]} : vector<16x162xf32> to vector<16x120xf32>
    %138 = vector.extract_strided_slice %131 {offsets = [0, 21], sizes = [16, 120], strides = [1, 1]} : vector<16x162xf32> to vector<16x120xf32>
    %139 = vector.extract_strided_slice %131 {offsets = [0, 22], sizes = [16, 120], strides = [1, 1]} : vector<16x162xf32> to vector<16x120xf32>
    %140 = vector.extract_strided_slice %131 {offsets = [0, 40], sizes = [16, 120], strides = [1, 1]} : vector<16x162xf32> to vector<16x120xf32>
    %141 = vector.extract_strided_slice %131 {offsets = [0, 41], sizes = [16, 120], strides = [1, 1]} : vector<16x162xf32> to vector<16x120xf32>
    %142 = vector.extract_strided_slice %131 {offsets = [0, 42], sizes = [16, 120], strides = [1, 1]} : vector<16x162xf32> to vector<16x120xf32>
    %143 = tpu.concatenate %134, %135, %136, %137, %138, %139, %140, %141, %142 in 0 : vector<16x120xf32>, vector<16x120xf32>, vector<16x120xf32>, vector<16x120xf32>, vector<16x120xf32>, vector<16x120xf32>, vector<16x120xf32>, vector<16x120xf32>, vector<16x120xf32> -> vector<144x120xf32>
    %cst_47 = arith.constant dense<0.000000e+00> : vector<2x120xf32>
    %144 = tpu.matmul %132, %143, %cst_47 {dimension_numbers = #tpu.dot_dimension_numbers<[1], [0], [0], [1], [0, 0, 1, 1], [], []>} : vector<2x144xf32>, vector<144x120xf32>, vector<2x120xf32> -> vector<2x120xf32>
    %145 = vector.broadcast %133 : vector<2x1xf32> to vector<2x120xf32>
    %146 = arith.addf %144, %145 : vector<2x120xf32>
    %c0_48 = arith.constant 0 : index
    %c0_49 = arith.constant 0 : index
    %c0_50 = arith.constant 0 : index
    %147 = vector.load %arg16[%c0_48, %c0_49, %c0_50] : memref<1x2x120xf32, #tpu.memory_space<vmem>>, vector<1x2x120xf32>
    %148 = vector.shape_cast %147 : vector<1x2x120xf32> to vector<2x120xf32>
    %149 = vector.shape_cast %146 : vector<2x120xf32> to vector<1x2x120xf32>
    tpu.vector_store %arg16[%c0_48, %c0_49, %c0_50], %149 {strides = array<i32>} : memref<1x2x120xf32, #tpu.memory_space<vmem>>, vector<1x2x120xf32>,
    return
  }
  func.func @transform_0(%arg0: i32) -> (i32, i32, i32) {
    %c0_i32 = arith.constant 0 : i32
    %c0_i32_0 = arith.constant 0 : i32
    %c0_i32_1 = arith.constant 0 : i32
    return %arg0, %c0_i32, %c0_i32_0 : i32, i32, i32
  }
  func.func @transform_1(%arg0: i32) -> (i32, i32) {
    %c0_i32 = arith.constant 0 : i32
    %c0_i32_0 = arith.constant 0 : i32
    %c0_i32_1 = arith.constant 0 : i32
    return %c0_i32, %c0_i32_0 : i32, i32
  }
  func.func @transform_2(%arg0: i32) -> (i32, i32) {
    %c0_i32 = arith.constant 0 : i32
    %c0_i32_0 = arith.constant 0 : i32
    %c0_i32_1 = arith.constant 0 : i32
    return %c0_i32, %c0_i32_0 : i32, i32
  }
  func.func @transform_3(%arg0: i32) -> (i32, i32) {
    %c0_i32 = arith.constant 0 : i32
    %c0_i32_0 = arith.constant 0 : i32
    %c0_i32_1 = arith.constant 0 : i32
    return %c0_i32, %c0_i32_0 : i32, i32
  }
  func.func @transform_4(%arg0: i32) -> (i32, i32) {
    %c0_i32 = arith.constant 0 : i32
    %c0_i32_0 = arith.constant 0 : i32
    %c0_i32_1 = arith.constant 0 : i32
    return %c0_i32, %c0_i32_0 : i32, i32
  }
  func.func @transform_5(%arg0: i32) -> (i32, i32) {
    %c0_i32 = arith.constant 0 : i32
    %c0_i32_0 = arith.constant 0 : i32
    %c0_i32_1 = arith.constant 0 : i32
    return %c0_i32, %c0_i32_0 : i32, i32
  }
  func.func @transform_6(%arg0: i32) -> (i32, i32) {
    %c0_i32 = arith.constant 0 : i32
    %c0_i32_0 = arith.constant 0 : i32
    %c0_i32_1 = arith.constant 0 : i32
    return %c0_i32, %c0_i32_0 : i32, i32
  }
  func.func @transform_7(%arg0: i32) -> (i32, i32) {
    %c0_i32 = arith.constant 0 : i32
    %c0_i32_0 = arith.constant 0 : i32
    %c0_i32_1 = arith.constant 0 : i32
    return %c0_i32, %c0_i32_0 : i32, i32
  }
  func.func @transform_8(%arg0: i32) -> (i32, i32) {
    %c0_i32 = arith.constant 0 : i32
    %c0_i32_0 = arith.constant 0 : i32
    %c0_i32_1 = arith.constant 0 : i32
    return %c0_i32, %c0_i32_0 : i32, i32
  }
  func.func @transform_9(%arg0: i32) -> (i32, i32) {
    %c0_i32 = arith.constant 0 : i32
    %c0_i32_0 = arith.constant 0 : i32
    %c0_i32_1 = arith.constant 0 : i32
    return %c0_i32, %c0_i32_0 : i32, i32
  }
  func.func @transform_10(%arg0: i32) -> (i32, i32) {
    %c0_i32 = arith.constant 0 : i32
    %c0_i32_0 = arith.constant 0 : i32
    %c0_i32_1 = arith.constant 0 : i32
    return %c0_i32, %c0_i32_0 : i32, i32
  }
  func.func @transform_11(%arg0: i32) -> (i32, i32) {
    %c0_i32 = arith.constant 0 : i32
    %c0_i32_0 = arith.constant 0 : i32
    %c0_i32_1 = arith.constant 0 : i32
    return %c0_i32, %c0_i32_0 : i32, i32
  }
  func.func @transform_12(%arg0: i32) -> (i32, i32) {
    %c0_i32 = arith.constant 0 : i32
    %c0_i32_0 = arith.constant 0 : i32
    %c0_i32_1 = arith.constant 0 : i32
    return %c0_i32, %c0_i32_0 : i32, i32
  }
  func.func @transform_13(%arg0: i32) -> (i32, i32) {
    %c0_i32 = arith.constant 0 : i32
    %c0_i32_0 = arith.constant 0 : i32
    %c0_i32_1 = arith.constant 0 : i32
    return %c0_i32, %c0_i32_0 : i32, i32
  }
  func.func @transform_14(%arg0: i32) -> (i32, i32) {
    %c0_i32 = arith.constant 0 : i32
    %c0_i32_0 = arith.constant 0 : i32
    %c0_i32_1 = arith.constant 0 : i32
    return %c0_i32, %c0_i32_0 : i32, i32
  }
  func.func @transform_15(%arg0: i32) -> (i32, i32, i32) {
    %c0_i32 = arith.constant 0 : i32
    %c0_i32_0 = arith.constant 0 : i32
    %c0_i32_1 = arith.constant 0 : i32
    return %arg0, %c0_i32, %c0_i32_0 : i32, i32, i32
  }
}

</mosaic_0001>

<bundles_post_ra>
// kernel: residual_discriminator_wo_padding.1
= control target key start
LH: loop header
LB: loop body
LE: loop exit
PB: predicated region body
PF: predicated region fallthrough
CT: control target
= control target key end

     0   :  { %s3173_s18 = smov 0   ;;  %s4139_s0 = inlined_call_operand.vmem [shape: f32[2,8,414], index: 0, kind: input, shape index: {}]   ;;  %s4140_s1 = inlined_call_operand.vmem [shape: f32[16,72], index: 1, kind: input, shape index: {}]   ;;  %s4141_s2 = inlined_call_operand.vmem [shape: f32[16,1], index: 2, kind: input, shape index: {}]   ;;  %s4142_s3 = inlined_call_operand.vmem [shape: f32[16,144], index: 3, kind: input, shape index: {}]   ;;  %s4143_s4 = inlined_call_operand.vmem [shape: f32[16,1], index: 4, kind: input, shape index: {}]   ;;  %s4144_s5 = inlined_call_operand.vmem [shape: f32[16,144], index: 5, kind: input, shape index: {}]   ;;  %s4145_s6 = inlined_call_operand.vmem [shape: f32[16,1], index: 6, kind: input, shape index: {}]   ;;  %s4146_s7 = inlined_call_operand.vmem [shape: f32[16,144], index: 7, kind: input, shape index: {}]   ;;  %s4147_s8 = inlined_call_operand.vmem [shape: f32[16,1], index: 8, kind: input, shape index: {}]   ;;  %s4148_s9 = inlined_call_operand.vmem [shape: f32[16,144], index: 9, kind: input, shape index: {}]   ;;  %s4149_s10 = inlined_call_operand.vmem [shape: f32[16,1], index: 10, kind: input, shape index: {}]   ;;  %s4150_s11 = inlined_call_operand.vmem [shape: f32[16,144], index: 11, kind: input, shape index: {}]   ;;  %s4151_s12 = inlined_call_operand.vmem [shape: f32[16,1], index: 12, kind: input, shape index: {}]   ;;  %s4152_s13 = inlined_call_operand.vmem [shape: f32[2,144], index: 13, kind: input, shape index: {}]   ;;  %s4153_s14 = inlined_call_operand.vmem [shape: f32[2,1], index: 14, kind: input, shape index: {}]   ;;  %s4154_s15 = inlined_call_operand.vmem [shape: f32[2,2,120], index: 15, kind: output, shape index: {}]  }
   0x1 LB: > { %s2429_s19 = sadd.s32 4294967295, %s3082_s18   ;;  %p2433_p0 = scmp.ge.s32.totalorder %s3082_s18, 1  ;;  %s3082_s18 = sphi %s3173_s18, %s25_s18  }
   0x2   : > { %p437_p1 = scmp.lt.s32.totalorder %s3082_s18, 3 }
   0x4   : > { %p438_p2 = pnand %p2433_p0, %p437_p1 }
   0x5   : > { %p484_p3 = scmp.lt.s32.totalorder (!%p438_p2), %s2429_s19, 1  ;;  %s3084_s24 = smov (!%p438_p2), 87  }
   0x6   : > { %441 = sbr.rel (%p438_p2) target bundleno = 2201 (0x899), region = 80  ;;  %s4155_s25 = smov (!%p438_p2), 86  }
   0x7   : > { %s3086_s26 = smov (!%p438_p2), 88   ;;  %s3087_s27 = smov (!%p438_p2), 106  }
   0x8   : > { %s3088_s28 = smov (!%p438_p2), 107   ;;  %s3089_s29 = smov (!%p438_p2), 108  }
   0x9   : > { %s3090_s30 = smov (!%p438_p2), 126   ;;  %s4157_s16 = smov (!%p438_p2), 127  }
   0xb   : > { %s4161_s19 = smov (!%p484_p3, %s2429_s19), 1  ;;  %vm612_vm0 = vcmask 703488   ;;  %vm597_vm1 = vcmask 711680   ;;  %vm582_vm2 = vcmask 719872   ;;  %vm567_vm3 = vcmask 867328   ;;  %v500_v47 = vld [vmem:[%s4141_s2 + $0x8] sm:$0xff] }
   0xc   : > { %s2470_s20 = sshll.u32 %s4161_s19, 5  ;;  %vm552_vm4 = vcmask 875520   ;;  %v3092_v48 = vmov 0   ;;  %v499_v49 = vld [vmem:[%s4141_s2] sm:$0xff]  ;;  %vm537_vm5 = vcmask 883712   ;;  %vm522_vm6 = vcmask 1031168  }
   0xd   : > { %s488_s23 = scalar_lea.vmem %s4139_s0, %s2470_s20  ;;  %2558 = vset.pattern.permute.xlu1 %v3092_v48  ;;  %2559 = vset.pattern.permute.xlu2 %v3092_v48  ;;  %vm510_vm7 = vcmask 1039360   ;;  %vm629_vm8 = vcmask 588800   ;;  %vm921_vm15 = vcmask 130048  }
   0xe   : > { %v3187_v0 = vld [vmem:[%s488_s23] sm:$0xff]  ;;  %v3189_v1 = vld [vmem:[%s488_s23 + $0x8] sm:$0xff]  ;;  %v3195_v3 = vld [vmem:[%s488_s23 + $0x10] sm:$0xff]  ;;  %2665 = vset.pattern.permute.xlu0 %v3092_v48 }
   0xf   : > { %v2498_v2 = vpack.i.bf16 %v3189_v1, %v3187_v0  ;;  %v496_v4 = vld [vmem:[%s488_s23 + $0x18] sm:$0xff] }
  0x10   : > { %v2503_v5 = vpack.i.bf16 %v496_v4, %v3195_v3 }
  0x11   : > { %2499 = vrot.lane.b32.xlu1 %v2498_v2, %s3084_s24  ;;  %2489 = vrot.lane.b32.xlu0 %v2498_v2, %s4155_s25 }
  0x12   : > { %2509 = vrot.lane.b32.xlu2 %v2498_v2, %s3086_s26 }
  0x19   : > { %2504 = vrot.lane.b32.xlu1 %v2503_v5, %s3084_s24  ;;  %2494 = vrot.lane.b32.xlu0 %v2503_v5, %s4155_s25 }
  0x1a   : > { %2514 = vrot.lane.b32.xlu2 %v2503_v5, %s3086_s26 }
  0x21   : > { %2524 = vrot.lane.b32.xlu1 %v2503_v5, %s3087_s27  ;;  %2519 = vrot.lane.b32.xlu0 %v2498_v2, %s3087_s27 }
  0x22   : > { %2529 = vrot.lane.b32.xlu2 %v2498_v2, %s3088_s28 }
  0x29   : > { %2534 = vrot.lane.b32.xlu0 %v2503_v5, %s3088_s28  ;;  %2539 = vrot.lane.b32.xlu1 %v2498_v2, %s3089_s29 }
  0x2a   : > { %2544 = vrot.lane.b32.xlu2 %v2503_v5, %s3089_s29 }
  0x31   : > { %2549 = vrot.lane.b32.xlu0 %v2498_v2, %s3090_s30  ;;  %520 = vrot.lane.b32.xlu1 %v3195_v3, %s3090_s30 }
  0x32   : > { %2554 = vrot.lane.b32.xlu2 %v2498_v2, %s4157_s16 }
  0x39   : > { %508 = vrot.lane.b32.xlu0 %v3195_v3, %s4157_s16  ;;  %626 = vperm.xlu1 %2558, %v500_v47  }
  0x3a   : > { %621 = vperm.xlu2 %2559, %v499_v49  }
  0x6c   : > { %v2510_v6 = vpop.permute.xlu2 %2509 }
  0x6d   : > { %v2512_v8 = vunpack.i.h.bf16 %v2510_v6  ;;  %v2511_v9 = vunpack.i.l.bf16 %v2510_v6 }
  0x6f   : > { %v583_v18 = vsel %vm582_vm2, %v2511_v9, %v2512_v8 }
  0x74   : > { %v2515_v7 = vpop.permute.xlu2 %2514 }
  0x75   : > { %v2517_v20 = vunpack.i.h.bf16 %v2515_v7  ;;  %v2516_v27 = vunpack.i.l.bf16 %v2515_v7 }
  0x77   : > { %v585_v32 = vsel %vm582_vm2, %v2516_v27, %v2517_v20  ;;  %v584_v33 = vsel %vm582_vm2, %v2512_v8, %v2516_v27 }
  0x7c   : > { %v2530_v19 = vpop.permute.xlu2 %2529 }
  0x7d   : > { %v2532_v34 = vunpack.i.h.bf16 %v2530_v19  ;;  %v2531_v35 = vunpack.i.l.bf16 %v2530_v19 }
  0x7f   : > { %v553_v45 = vsel %vm552_vm4, %v2531_v35, %v2532_v34 }
  0x83   : > { %v2500_v10 = vpop.permute.xlu1 %2499  ;;  %v2490_v11 = vpop.permute.xlu0 %2489 }
  0x84   : > { %v2502_v12 = vunpack.i.h.bf16 %v2500_v10  ;;  %v2501_v13 = vunpack.i.l.bf16 %v2500_v10  ;;  %v2492_v14 = vunpack.i.h.bf16 %v2490_v11  ;;  %v2491_v15 = vunpack.i.l.bf16 %v2490_v11  ;;  %v2545_v42 = vpop.permute.xlu2 %2544 }
  0x85   : > { %v2547_v50 = vunpack.i.h.bf16 %v2545_v42  ;;  %v2546_v51 = vunpack.i.l.bf16 %v2545_v42 }
  0x86   : > { %v613_v16 = vsel %vm612_vm0, %v2491_v15, %v2492_v14  ;;  %v598_v17 = vsel %vm597_vm1, %v2501_v13, %v2502_v12  ;;  %v498_v15 = vld [vmem:[%s4140_s1 + $0x8] sm:$0xff] }
  0x87   : > { %643 = vmatpush.msra.mxu0 %v613_v16  ;;  %v540_v58 = vsel %vm537_vm5, %v2546_v51, %v2547_v50 }
  0x89   : > { %644 = vmatpush.msra.mxu0 %v598_v17 }
  0x8b   : > { %v2505_v21 = vpop.permute.xlu1 %2504  ;;  %v2495_v22 = vpop.permute.xlu0 %2494  ;;  %645 = vmatpush.msra.mxu0 %v583_v18 }
  0x8c   : > { %v2507_v23 = vunpack.i.h.bf16 %v2505_v21  ;;  %v2506_v24 = vunpack.i.l.bf16 %v2505_v21  ;;  %v2497_v25 = vunpack.i.h.bf16 %v2495_v22  ;;  %v2496_v26 = vunpack.i.l.bf16 %v2495_v22  ;;  %v2555_v63 = vpop.permute.xlu2 %2554 }
  0x8d   : > { %v2557_v2 = vunpack.i.h.bf16 %v2555_v63  ;;  %v2556_v4 = vunpack.i.l.bf16 %v2555_v63 }
  0x8e   : > { %v614_v28 = vsel %vm612_vm0, %v2492_v14, %v2496_v26  ;;  %v615_v29 = vsel %vm612_vm0, %v2496_v26, %v2497_v25  ;;  %v600_v30 = vsel %vm597_vm1, %v2506_v24, %v2507_v23  ;;  %v599_v31 = vsel %vm597_vm1, %v2502_v12, %v2506_v24  ;;  %v497_v12 = vld [vmem:[%s4140_s1] sm:$0xff] }
  0x8f   : > { %666 = vmatpush.msra.mxu1 %v614_v28  ;;  %689 = vmatpush.msra.mxu2 %v615_v29  ;;  %v511_v11 = vsel %vm510_vm7, %v2556_v4, %v2557_v2 }
  0x91   : > { %667 = vmatpush.msra.mxu1 %v599_v31  ;;  %690 = vmatpush.msra.mxu2 %v600_v30 }
  0x93   : > { %v2525_v36 = vpop.permute.xlu1 %2524  ;;  %v2520_v37 = vpop.permute.xlu0 %2519  ;;  %668 = vmatpush.msra.mxu1 %v584_v33  ;;  %691 = vmatpush.msra.mxu2 %v585_v32 }
  0x94   : > { %v2527_v38 = vunpack.i.h.bf16 %v2525_v36  ;;  %v2526_v39 = vunpack.i.l.bf16 %v2525_v36  ;;  %v2522_v40 = vunpack.i.h.bf16 %v2520_v37  ;;  %v2521_v41 = vunpack.i.l.bf16 %v2520_v37  ;;  %v622_v16 = vpop.permute.xlu2 %621 }
  0x96   : > { %v568_v43 = vsel %vm567_vm3, %v2521_v41, %v2522_v40  ;;  %v569_v44 = vsel %vm567_vm3, %v2522_v40, %v2526_v39  ;;  %v570_v46 = vsel %vm567_vm3, %v2526_v39, %v2527_v38 }
  0x97   : > { %646 = vmatpush.msra.mxu0 %v568_v43  ;;  %669 = vmatpush.msra.mxu1 %v569_v44 }
  0x98   : > { %692 = vmatpush.msra.mxu2 %v570_v46 }
  0x99   : > { %647 = vmatpush.msra.mxu0 %v553_v45  ;;  %v727_v45 = vld [vmem:[%s4143_s4] sm:$0xff] }
  0x9b   : > { %v2535_v52 = vpop.permute.xlu0 %2534  ;;  %v2540_v53 = vpop.permute.xlu1 %2539 }
  0x9c   : > { %v2537_v54 = vunpack.i.h.bf16 %v2535_v52  ;;  %v2536_v55 = vunpack.i.l.bf16 %v2535_v52  ;;  %v2542_v56 = vunpack.i.h.bf16 %v2540_v53  ;;  %v2541_v57 = vunpack.i.l.bf16 %v2540_v53 }
  0x9e   : > { %v554_v59 = vsel %vm552_vm4, %v2532_v34, %v2536_v55  ;;  %v555_v60 = vsel %vm552_vm4, %v2536_v55, %v2537_v54  ;;  %v538_v61 = vsel %vm537_vm5, %v2541_v57, %v2542_v56  ;;  %v539_v62 = vsel %vm537_vm5, %v2542_v56, %v2546_v51 }
  0x9f   : > { %670 = vmatpush.msra.mxu1 %v554_v59  ;;  %693 = vmatpush.msra.mxu2 %v555_v60 }
  0xa0   : > { %648 = vmatpush.msra.mxu0 %v538_v61 }
  0xa1   : > { %671 = vmatpush.msra.mxu1 %v539_v62  ;;  %694 = vmatpush.msra.mxu2 %v540_v58 }
  0xa3   : > { %v2550_v5 = vpop.permute.xlu0 %2549  ;;  %v521_v6 = vpop.permute.xlu1 %520 }
  0xa4   : > { %v2552_v7 = vunpack.i.h.bf16 %v2550_v5  ;;  %v2551_v8 = vunpack.i.l.bf16 %v2550_v5  ;;  %695 = vmatpush.msra.mxu2 %v521_v6 }
  0xa6   : > { %v523_v9 = vsel %vm522_vm6, %v2551_v8, %v2552_v7  ;;  %v524_v10 = vsel %vm522_vm6, %v2552_v7, %v521_v6 }
  0xa7   : > { %649 = vmatpush.msra.mxu0 %v523_v9  ;;  %672 = vmatpush.msra.mxu1 %v524_v10 }
  0xa9   : > { %650 = vmatpush.msra.mxu0 %v511_v11 }
  0xab   : > { %v509_v13 = vpop.permute.xlu0 %508  ;;  %651 = vmatpush.msra.mxu0 %v3187_v0  ;;  %v627_v23 = vpop.permute.xlu1 %626 }
  0xac   : > { %2437 = vmatmul.msk.f32.vlgmr.msra.gmra.mxu0 %vm629_vm8, %v497_v12  ;;  %696 = vmatpush.msra.mxu2 %v509_v13  ;;  %v512_v14 = vsel %vm510_vm7, %v2557_v2, %v509_v13 }
  0xad   : > { %673 = vmatpush.msra.mxu1 %v512_v14 }
  0xae   : > { %697 = vmatpush.msra.mxu2 %v3195_v3 }
  0xaf   : > { %674 = vmatpush.msra.mxu1 %v3189_v1  ;;  %2441 = vmatmul.msk.f32.vlgmr.msra.gmra.mxu2 %vm629_vm8, %v497_v12 }
  0xb0   : > { %2439 = vmatmul.msk.f32.vlgmr.msra.gmra.mxu1 %vm629_vm8, %v497_v12 }
  0xb4   : > { %2438 = vmatmul.msk.f32.gmra.mxu0 %vm629_vm8, %v498_v15 }
  0xb7   : > { %2442 = vmatmul.msk.f32.gmra.mxu2 %vm629_vm8, %v498_v15 }
  0xb8   : > { %2440 = vmatmul.msk.f32.gmra.mxu1 %vm629_vm8, %v498_v15 }
 0x129   : > { %v653_v0 = vpop.f32.mrf.mxu0 }
 0x12a   : > { %v654_v17 = vadd.f32 %v653_v0, %v622_v16 }
 0x12c   : > { %v711_v19 = vmul.f32 0.2, %v654_v17  ;;  %vm705_vm9 = vcmp.ge.f32.partialorder %v654_v17, 0.0 }
 0x12d   : > { %v676_v18 = vpop.f32.mrf.mxu1 }
 0x12e   : > { %v677_v20 = vadd.f32 %v676_v18, %v622_v16  ;;  %v3251_v21 = vsel %vm705_vm9, %v654_v17, %v711_v19 }
 0x130   : > { %vm706_vm10 = vcmp.ge.f32.partialorder %v677_v20, 0.0  ;;  %v712_v3 = vmul.f32 0.2, %v677_v20 }
 0x131   : > { %v656_v24 = vpop.f32.mrf.mxu0 }
 0x132   : > { %v3253_v1 = vsel %vm706_vm10, %v677_v20, %v712_v3  ;;  %v699_v27 = vpop.f32.mrf.mxu2  ;;  %v657_v28 = vadd.f32 %v656_v24, %v627_v23 }
 0x133   : > { %803 = vrot.lane.b32.xlu2 %v3253_v1, %s3088_s28  ;;  %v2565_v22 = vpack.i.bf16 %v3253_v1, %v3251_v21  ;;  %v700_v29 = vadd.f32 %v699_v27, %v622_v16 }
 0x134   : > { %v714_v31 = vmul.f32 0.2, %v657_v28  ;;  %vm708_vm12 = vcmp.ge.f32.partialorder %v657_v28, 0.0 }
 0x135   : > { %2566 = vrot.lane.b32.xlu0 %v2565_v22, %s3086_s26  ;;  %2561 = vrot.lane.b32.xlu1 %v2565_v22, %s3084_s24  ;;  %v679_v25 = vpop.f32.mrf.mxu1  ;;  %v713_v32 = vmul.f32 0.2, %v700_v29  ;;  %vm707_vm13 = vcmp.ge.f32.partialorder %v700_v29, 0.0 }
 0x136   : > { %v680_v26 = vadd.f32 %v679_v25, %v627_v23  ;;  %v3267_v34 = vsel %vm708_vm12, %v657_v28, %v714_v31 }
 0x137   : > { %v3271_v36 = vsel %vm707_vm13, %v700_v29, %v713_v32  ;;  %v2660_v42 = vpack.i.bf16 %v3251_v21, %v3267_v34 }
 0x138   : > { %v715_v30 = vmul.f32 0.2, %v680_v26  ;;  %vm709_vm11 = vcmp.ge.f32.partialorder %v680_v26, 0.0  ;;  %v2655_v44 = vpack.i.bf16 %v3271_v36, %v3253_v1 }
 0x13a   : > { %v3265_v33 = vsel %vm709_vm11, %v680_v26, %v715_v30  ;;  %v702_v37 = vpop.f32.mrf.mxu2 }
 0x13b   : > { %2576 = vrot.lane.b32.xlu2 %v2565_v22, %s3089_s29  ;;  %v2600_v35 = vpack.i.bf16 %v3265_v33, %v3267_v34  ;;  %v703_v38 = vadd.f32 %v702_v37, %v627_v23 }
 0x13d   : > { %2571 = vrot.lane.b32.xlu0 %v2565_v22, %s3087_s27  ;;  %801 = vrot.lane.b32.xlu1 %v3251_v21, %s3088_s28  ;;  %v716_v39 = vmul.f32 0.2, %v703_v38  ;;  %vm710_vm14 = vcmp.ge.f32.partialorder %v703_v38, 0.0 }
 0x13f   : > { %v3280_v40 = vsel %vm710_vm14, %v703_v38, %v716_v39 }
 0x140   : > { %v2615_v41 = vpack.i.bf16 %v3271_v36, %v3280_v40  ;;  %v2650_v43 = vpack.i.bf16 %v3280_v40, %v3265_v33 }
 0x143   : > { %805 = vrot.lane.b32.xlu2 %v3271_v36, %s3088_s28 }
 0x145   : > { %2581 = vrot.lane.b32.xlu0 %v2565_v22, %s3090_s30  ;;  %2601 = vrot.lane.b32.xlu1 %v2600_v35, %s3089_s29 }
 0x14b   : > { %2591 = vrot.lane.b32.xlu2 %v2600_v35, %s3086_s26 }
 0x14d   : > { %2586 = vrot.lane.b32.xlu0 %v2600_v35, %s3084_s24  ;;  %2606 = vrot.lane.b32.xlu1 %v2600_v35, %s3090_s30 }
 0x153   : > { %2596 = vrot.lane.b32.xlu2 %v2600_v35, %s3087_s27 }
 0x155   : > { %809 = vrot.lane.b32.xlu0 %v3265_v33, %s3088_s28  ;;  %2616 = vrot.lane.b32.xlu1 %v2615_v41, %s3084_s24 }
 0x15b   : > { %807 = vrot.lane.b32.xlu2 %v3267_v34, %s3088_s28 }
 0x15d   : > { %2626 = vrot.lane.b32.xlu0 %v2615_v41, %s3087_s27  ;;  %2621 = vrot.lane.b32.xlu1 %v2615_v41, %s3086_s26 }
 0x163   : > { %2611 = vrot.lane.b32.xlu2 %v2600_v35, %s4157_s16 }
 0x165   : > { %811 = vrot.lane.b32.xlu0 %v3280_v40, %s3088_s28  ;;  %2636 = vrot.lane.b32.xlu1 %v2615_v41, %s3089_s29 }
 0x16b   : > { %2646 = vrot.lane.b32.xlu2 %v2615_v41, %s4157_s16 }
 0x16d   : > { %2631 = vrot.lane.b32.xlu0 %v2565_v22, %s4157_s16  ;;  %2641 = vrot.lane.b32.xlu1 %v2615_v41, %s3090_s30 }
 0x173   : > { %2661 = vrot.lane.b32.xlu2 %v2660_v42, %s4155_s25 }
 0x175   : > { %2651 = vrot.lane.b32.xlu0 %v2650_v43, %s4155_s25  ;;  %2656 = vrot.lane.b32.xlu1 %v2655_v44, %s4155_s25 }
 0x17d   : > { %913 = vperm.xlu1 %2558, %v727_v45  }
 0x18d   : > { %v3311_v46 = vpop.permute.xlu2 %803 }
 0x195   : > { %v3313_v47 = vpop.permute.xlu2 %2576 }
 0x196   : > { %v2579_v25 = vunpack.i.h.bf16 %v3313_v47  ;;  %v2578_v26 = vunpack.i.l.bf16 %v3313_v47 }
 0x198   : > { %v791_v42 = vsel %vm537_vm5, %v2578_v26, %v2579_v25 }
 0x19d   : > { %v3317_v50 = vpop.permute.xlu2 %805 }
 0x1a5   : > { %v2592_v53 = vpop.permute.xlu2 %2591 }
 0x1a6   : > { %v2594_v63 = vunpack.i.h.bf16 %v2592_v53  ;;  %v2593_v2 = vunpack.i.l.bf16 %v2592_v53 }
 0x1a7   : > { %v3315_v48 = vpop.permute.xlu0 %2566  ;;  %v2562_v49 = vpop.permute.xlu1 %2561 }
 0x1a8   : > { %v2564_v59 = vunpack.i.h.bf16 %v2562_v49  ;;  %v2563_v60 = vunpack.i.l.bf16 %v2562_v49  ;;  %v2569_v5 = vunpack.i.h.bf16 %v3315_v48  ;;  %v2568_v6 = vunpack.i.l.bf16 %v3315_v48 }
 0x1a9   : > { %v859_v11 = vsel %vm582_vm2, %v2593_v2, %v2594_v63 }
 0x1aa   : > { %v879_v7 = vsel %vm597_vm1, %v2563_v60, %v2564_v59  ;;  %v857_v14 = vsel %vm582_vm2, %v2568_v6, %v2569_v5 }
 0x1ad   : > { %v3325_v56 = vpop.permute.xlu2 %2596 }
 0x1ae   : > { %v2599_v8 = vunpack.i.h.bf16 %v3325_v56  ;;  %v2598_v9 = vunpack.i.l.bf16 %v3325_v56 }
 0x1af   : > { %v3319_v51 = vpop.permute.xlu0 %2571  ;;  %v802_v52 = vpop.permute.xlu1 %801 }
 0x1b0   : > { %v2574_v15 = vunpack.i.h.bf16 %v3319_v51  ;;  %v2573_v16 = vunpack.i.l.bf16 %v3319_v51  ;;  %v837_v18 = vsel %vm567_vm3, %v2598_v9, %v2599_v8  ;;  %v3369_v32 = vsel %vm552_vm4, %v802_v52, %v3311_v46 }
 0x1b2   : > { %v835_v20 = vsel %vm567_vm3, %v2573_v16, %v2574_v15  ;;  %v723_v16 = vld [vmem:[%s4142_s3] sm:$0xff] }
 0x1b5   : > { %v808_v10 = vpop.permute.xlu2 %807 }
 0x1b7   : > { %v3321_v54 = vpop.permute.xlu0 %2581  ;;  %v3323_v55 = vpop.permute.xlu1 %2601 }
 0x1b8   : > { %v2604_v22 = vunpack.i.h.bf16 %v3323_v55  ;;  %v2603_v23 = vunpack.i.l.bf16 %v3323_v55  ;;  %v2584_v43 = vunpack.i.h.bf16 %v3321_v54  ;;  %v2583_v44 = vunpack.i.l.bf16 %v3321_v54 }
 0x1ba   : > { %v793_v35 = vsel %vm537_vm5, %v2603_v23, %v2604_v22  ;;  %v769_v55 = vsel %vm522_vm6, %v2583_v44, %v2584_v43 }
 0x1bd   : > { %v3363_v29 = vpop.permute.xlu2 %2611 }
 0x1be   : > { %v2614_v48 = vunpack.i.h.bf16 %v3363_v29  ;;  %v2613_v49 = vunpack.i.l.bf16 %v3363_v29 }
 0x1bf   : > { %v2587_v57 = vpop.permute.xlu0 %2586  ;;  %v3327_v58 = vpop.permute.xlu1 %2606 }
 0x1c0   : > { %v2589_v61 = vunpack.i.h.bf16 %v2587_v57  ;;  %v2588_v62 = vunpack.i.l.bf16 %v2587_v57  ;;  %v2609_v37 = vunpack.i.h.bf16 %v3327_v58  ;;  %v2608_v38 = vunpack.i.l.bf16 %v3327_v58 }
 0x1c2   : > { %v881_v4 = vsel %vm597_vm1, %v2588_v62, %v2589_v61  ;;  %v771_v51 = vsel %vm522_vm6, %v2608_v38, %v2609_v37  ;;  %v3413_v62 = vsel %vm552_vm4, %v3311_v46, %v3317_v50 }
 0x1c3   : > { %928 = vmatpush.msra.mxu3 %v881_v4 }
 0x1c5   : > { %929 = vmatpush.msra.mxu3 %v879_v7  ;;  %v3400_v57 = vpop.permute.xlu2 %2646 }
 0x1c6   : > { %v2648_v9 = vunpack.i.l.bf16 %v3400_v57 }
 0x1c7   : > { %v810_v12 = vpop.permute.xlu0 %809  ;;  %v3336_v13 = vpop.permute.xlu1 %2616  ;;  %930 = vmatpush.msra.mxu3 %v859_v11 }
 0x1c8   : > { %v2619_v0 = vunpack.i.h.bf16 %v3336_v13  ;;  %v2618_v17 = vunpack.i.l.bf16 %v3336_v13  ;;  %v3354_v24 = vsel %vm552_vm4, %v808_v10, %v810_v12 }
 0x1c9   : > { %931 = vmatpush.msra.mxu3 %v857_v14 }
 0x1ca   : > { %v882_v19 = vsel %vm597_vm1, %v2589_v61, %v2618_v17  ;;  %v880_v3 = vsel %vm597_vm1, %v2564_v59, %v2619_v0  ;;  %v749_v59 = vsel %vm510_vm7, %v2613_v49, %v2614_v48 }
 0x1cb   : > { %932 = vmatpush.msra.mxu3 %v837_v18  ;;  %974 = vmatpush.msrb.mxu1 %v882_v19  ;;  %v2649_v18 = vunpack.i.h.bf16 %v3400_v57  ;;  %v750_v19 = vsel %vm510_vm7, %v2614_v48, %v2648_v9 }
 0x1cd   : > { %933 = vmatpush.msra.mxu3 %v835_v20  ;;  %975 = vmatpush.msrb.mxu1 %v880_v3  ;;  %v2662_v14 = vpop.permute.xlu2 %2661 }
 0x1ce   : > { %v2663_v20 = vunpack.i.l.bf16 %v2662_v14 }
 0x1cf   : > { %v3358_v27 = vpop.permute.xlu0 %2626  ;;  %v3360_v28 = vpop.permute.xlu1 %2621  ;;  %934 = vmatpush.msra.mxu3 %v3354_v24 }
 0x1d0   : > { %v2624_v30 = vunpack.i.h.bf16 %v3360_v28  ;;  %v2623_v31 = vunpack.i.l.bf16 %v3360_v28  ;;  %v2628_v39 = vunpack.i.l.bf16 %v3358_v27  ;;  %v2629_v45 = vunpack.i.h.bf16 %v3358_v27 }
 0x1d1   : > { %935 = vmatpush.msra.mxu3 %v3369_v32 }
 0x1d2   : > { %v860_v41 = vsel %vm582_vm2, %v2594_v63, %v2623_v31  ;;  %v858_v47 = vsel %vm582_vm2, %v2569_v5, %v2624_v30  ;;  %v838_v52 = vsel %vm567_vm3, %v2599_v8, %v2628_v39  ;;  %v836_v56 = vsel %vm567_vm3, %v2574_v15, %v2629_v45 }
 0x1d3   : > { %936 = vmatpush.msra.mxu3 %v793_v35  ;;  %976 = vmatpush.msrb.mxu1 %v860_v41  ;;  %v2664_v35 = vunpack.i.h.bf16 %v2662_v14  ;;  %v724_v41 = vld [vmem:[%s4142_s3 + $0x8] sm:$0xff] }
 0x1d5   : > { %937 = vmatpush.msra.mxu3 %v791_v42  ;;  %977 = vmatpush.msrb.mxu1 %v858_v47 }
 0x1d7   : > { %v3392_v53 = vpop.permute.xlu0 %811  ;;  %v3394_v54 = vpop.permute.xlu1 %2636  ;;  %938 = vmatpush.msra.mxu3 %v771_v51  ;;  %978 = vmatpush.msrb.mxu1 %v838_v52 }
 0x1d8   : > { %v2638_v58 = vunpack.i.l.bf16 %v3394_v54  ;;  %v3406_v60 = vsel %vm552_vm4, %v810_v12, %v3392_v53  ;;  %v2639_v61 = vunpack.i.h.bf16 %v3394_v54  ;;  %v728_v12 = vld [vmem:[%s4143_s4 + $0x8] sm:$0xff] }
 0x1d9   : > { %939 = vmatpush.msra.mxu3 %v769_v55  ;;  %979 = vmatpush.msrb.mxu1 %v836_v56 }
 0x1da   : > { %v794_v63 = vsel %vm537_vm5, %v2604_v22, %v2638_v58  ;;  %v792_v5 = vsel %vm537_vm5, %v2579_v25, %v2639_v61  ;;  %918 = vperm.xlu0 %2665, %v728_v12  }
 0x1db   : > { %940 = vmatpush.msra.mxu3 %v749_v59  ;;  %980 = vmatpush.msrb.mxu1 %v3406_v60 }
 0x1dd   : > { %981 = vmatpush.msrb.mxu1 %v3413_v62 }
 0x1df   : > { %v2632_v2 = vpop.permute.xlu0 %2631  ;;  %v3419_v4 = vpop.permute.xlu1 %2641  ;;  %982 = vmatpush.msrb.mxu1 %v794_v63 }
 0x1e0   : > { %v2634_v6 = vunpack.i.h.bf16 %v2632_v2  ;;  %v2633_v7 = vunpack.i.l.bf16 %v2632_v2  ;;  %v2644_v8 = vunpack.i.h.bf16 %v3419_v4  ;;  %v2643_v46 = vunpack.i.l.bf16 %v3419_v4 }
 0x1e1   : > { %983 = vmatpush.msrb.mxu1 %v792_v5 }
 0x1e2   : > { %v747_v10 = vsel %vm510_vm7, %v2633_v7, %v2634_v6  ;;  %v772_v11 = vsel %vm522_vm6, %v2609_v37, %v2643_v46  ;;  %v770_v15 = vsel %vm522_vm6, %v2584_v43, %v2644_v8  ;;  %v748_v26 = vsel %vm510_vm7, %v2634_v6, %v2649_v18 }
 0x1e3   : > { %941 = vmatpush.msra.mxu3 %v747_v10  ;;  %984 = vmatpush.msrb.mxu1 %v772_v11 }
 0x1e5   : > { %942 = vmatpush.msra.mxu3 %v3267_v34  ;;  %985 = vmatpush.msrb.mxu1 %v770_v15 }
 0x1e7   : > { %v2652_v3 = vpop.permute.xlu0 %2651  ;;  %v2657_v22 = vpop.permute.xlu1 %2656  ;;  %943 = vmatpush.msra.mxu3 %v3251_v21  ;;  %986 = vmatpush.msrb.mxu1 %v750_v19 }
 0x1e8   : > { %v2654_v23 = vunpack.i.h.bf16 %v2652_v3  ;;  %v2653_v25 = vunpack.i.l.bf16 %v2652_v3  ;;  %v2658_v34 = vunpack.i.l.bf16 %v2657_v22  ;;  %944 = vmatmul.f32.vlgmr.msra.gmra.mxu3 %v723_v16  ;;  %v2659_v29 = vunpack.i.h.bf16 %v2657_v22 }
 0x1e9   : > { %1020 = vmatpush.msrb.mxu3 %v2618_v17  ;;  %987 = vmatpush.msrb.mxu1 %v748_v26 }
 0x1ea   : > { %v903_v37 = vsel %vm612_vm0, %v2663_v20, %v2653_v25  ;;  %v904_v38 = vsel %vm612_vm0, %v2653_v25, %v2654_v23  ;;  %v901_v21 = vsel %vm612_vm0, %v2664_v35, %v2658_v34  ;;  %v902_v17 = vsel %vm612_vm0, %v2658_v34, %v2659_v29 }
 0x1eb   : > { %1021 = vmatpush.msrb.mxu3 %v2619_v0  ;;  %965 = vmatpush.msrb.mxu0 %v903_v37 }
 0x1ec   : > { %988 = vmatpush.msrb.mxu1 %v3265_v33  ;;  %1011 = vmatpush.msrb.mxu2 %v904_v38  ;;  %v725_v33 = vld [vmem:[%s4142_s3 + $0x10] sm:$0xff] }
 0x1ed   : > { %1022 = vmatpush.msrb.mxu3 %v2623_v31  ;;  %966 = vmatpush.msrb.mxu0 %v901_v21 }
 0x1ee   : > { %989 = vmatpush.msrb.mxu1 %v3253_v1  ;;  %1012 = vmatpush.msrb.mxu2 %v902_v17  ;;  %v726_v1 = vld [vmem:[%s4142_s3 + $0x18] sm:$0xff] }
 0x1ef   : > { %990 = vmatmul.f32.vlgmr.msrb.gmra.mxu1 %v723_v16  ;;  %2445 = vmatmul.msk.f32.vlgmr.msrb.gmra.mxu2 %vm921_vm15, %v724_v41  ;;  %v914_v13 = vpop.permute.xlu1 %913 }
 0x1f0   : > { %1023 = vmatpush.msrb.mxu3 %v2624_v30  ;;  %1057 = vmatpush.msra.mxu0 %v2654_v23 }
 0x1f1   : > { %947 = vmatmul.f32.gmra.mxu3 %v725_v33  ;;  %2443 = vmatmul.msk.f32.vlgmr.msrb.gmra.mxu0 %vm921_vm15, %v724_v41 }
 0x1f2   : > { %1024 = vmatpush.msrb.mxu3 %v2628_v39  ;;  %1058 = vmatpush.msra.mxu0 %v2659_v29 }
 0x1f4   : > { %1025 = vmatpush.msrb.mxu3 %v2629_v45 }
 0x1f6   : > { %1026 = vmatpush.msrb.mxu3 %v3392_v53 }
 0x1f7   : > { %2446 = vmatmul.msk.f32.gmra.mxu2 %vm921_vm15, %v726_v1  ;;  %993 = vmatmul.f32.gmra.mxu1 %v725_v33 }
 0x1f8   : > { %1027 = vmatpush.msrb.mxu3 %v3317_v50 }
 0x1f9   : > { %2444 = vmatmul.msk.f32.gmra.mxu0 %vm921_vm15, %v726_v1 }
 0x1fa   : > { %1028 = vmatpush.msrb.mxu3 %v2638_v58 }
 0x1fc   : > { %1029 = vmatpush.msrb.mxu3 %v2639_v61 }
 0x1fe   : > { %1030 = vmatpush.msrb.mxu3 %v2643_v46 }
 0x200   : > { %1031 = vmatpush.msrb.mxu3 %v2644_v8 }
 0x201   : > { %2447 = vmatmul.msk.f32.vlgmr.msra.gmra.mxu0 %vm921_vm15, %v724_v41 }
 0x202   : > { %1032 = vmatpush.msrb.mxu3 %v2648_v9 }
 0x204   : > { %1033 = vmatpush.msrb.mxu3 %v2649_v18 }
 0x206   : > { %1034 = vmatpush.msrb.mxu3 %v3280_v40 }
 0x208   : > { %1035 = vmatpush.msrb.mxu3 %v3271_v36 }
 0x209   : > { %1036 = vmatmul.f32.vlgmr.msrb.gmra.mxu3 %v723_v16  ;;  %2448 = vmatmul.msk.f32.gmra.mxu0 %vm921_vm15, %v726_v1 }
 0x211   : > { %1039 = vmatmul.f32.gmra.mxu3 %v725_v33 }
 0x24c   : > { %v919_v44 = vpop.permute.xlu0 %918 }
 0x26b   : > { %v945_v0 = vpop.f32.mrf.mxu3 }
 0x26c   : > { %v946_v27 = vadd.f32 %v945_v0, %v914_v13  ;;  %v991_v28 = vpop.f32.mrf.mxu1 }
 0x26d   : > { %v992_v39 = vadd.f32 %v991_v28, %v914_v13 }
 0x26e   : > { %v968_v30 = vpop.f32.mrf.mxu0 }
 0x26f   : > { %v969_v31 = vadd.f32 %v968_v30, %v946_v27 }
 0x271   : > { %v1072_v42 = vmul.f32 0.2, %v969_v31  ;;  %vm1066_vm8 = vcmp.ge.f32.partialorder %v969_v31, 0.0 }
 0x272   : > { %v1014_v43 = vpop.f32.mrf.mxu2 }
 0x273   : > { %v1015_v45 = vadd.f32 %v1014_v43, %v992_v39  ;;  %v1078_v48 = vsel %vm1066_vm8, %v969_v31, %v1072_v42 }
 0x274   : > { %v948_v47 = vpop.f32.mrf.mxu3  ;;  %v994_v40 = vpop.f32.mrf.mxu1  ;;  %v3491_v56 = vadd.f32 %v1078_v48, %v3369_v32 }
 0x275   : > { %vm1067_vm9 = vcmp.ge.f32.partialorder %v1015_v45, 0.0  ;;  %v1073_v36 = vmul.f32 0.2, %v1015_v45  ;;  %v949_v49 = vadd.f32 %v948_v47, %v919_v44  ;;  %v995_v55 = vadd.f32 %v994_v40, %v919_v44 }
 0x276   : > { %v971_v51 = vpop.f32.mrf.mxu0 }
 0x277   : > { %v1079_v52 = vsel %vm1067_vm9, %v1015_v45, %v1073_v36  ;;  %v972_v54 = vadd.f32 %v971_v51, %v949_v49 }
 0x278   : > { %v3494_v57 = vadd.f32 %v1079_v52, %v3413_v62 }
 0x279   : > { %v1075_v58 = vmul.f32 0.2, %v972_v54  ;;  %vm1069_vm10 = vcmp.ge.f32.partialorder %v972_v54, 0.0 }
 0x27a   : > { %v1017_v59 = vpop.f32.mrf.mxu2  ;;  %v2676_v61 = vpack.i.bf16 %v3494_v57, %v3491_v56 }
 0x27b   : > { %v1018_v63 = vadd.f32 %v1017_v59, %v995_v55  ;;  %v1081_v2 = vsel %vm1069_vm10, %v972_v54, %v1075_v58 }
 0x27c   : > { %2677 = vrot.lane.b32.xlu2 %v2676_v61, %s3087_s27  ;;  %2672 = vrot.lane.b32.xlu0 %v2676_v61, %s3086_s26  ;;  %v3502_v62 = vadd.f32 %v1081_v2, %v3354_v24 }
 0x27d   : > { %vm1070_vm11 = vcmp.ge.f32.partialorder %v1018_v63, 0.0  ;;  %v1076_v4 = vmul.f32 0.2, %v1018_v63  ;;  %2667 = vrot.lane.b32.xlu1 %v2676_v61, %s3084_s24 }
 0x27e   : > { %v1060_v7 = vpop.f32.mrf.mxu0 }
 0x27f   : > { %v1082_v32 = vsel %vm1070_vm11, %v1018_v63, %v1076_v4 }
 0x280   : > { %v3505_v5 = vadd.f32 %v1082_v32, %v3406_v60 }
 0x282   : > { %v2706_v6 = vpack.i.bf16 %v3505_v5, %v3502_v62 }
 0x284   : > { %1168 = vrot.lane.b32.xlu2 %v3491_v56, %s3088_s28  ;;  %1170 = vrot.lane.b32.xlu0 %v3494_v57, %s3088_s28 }
 0x285   : > { %2707 = vrot.lane.b32.xlu1 %v2706_v6, %s3087_s27 }
 0x286   : > { %v1063_v9 = vpop.f32.mrf.mxu0 }
 0x28c   : > { %v1037_v8 = vpop.f32.mrf.mxu3  ;;  %2682 = vrot.lane.b32.xlu2 %v2676_v61, %s3089_s29  ;;  %1174 = vrot.lane.b32.xlu0 %v3502_v62, %s3088_s28 }
 0x28d   : > { %v1038_v24 = vadd.f32 %v1037_v8, %v914_v13  ;;  %1176 = vrot.lane.b32.xlu1 %v3505_v5, %s3088_s28 }
 0x28f   : > { %v1061_v60 = vadd.f32 %v1060_v7, %v1038_v24 }
 0x291   : > { %v1074_v10 = vmul.f32 0.2, %v1061_v60  ;;  %vm1068_vm12 = vcmp.ge.f32.partialorder %v1061_v60, 0.0 }
 0x293   : > { %v1080_v14 = vsel %vm1068_vm12, %v1061_v60, %v1074_v10 }
 0x294   : > { %v1040_v46 = vpop.f32.mrf.mxu3  ;;  %2687 = vrot.lane.b32.xlu2 %v2706_v6, %s3084_s24  ;;  %2717 = vrot.lane.b32.xlu0 %v2706_v6, %s3090_s30  ;;  %v3523_v18 = vadd.f32 %v1080_v14, %v3317_v50  ;;  %v1095_v50 = vld [vmem:[%s4145_s6 + $0x8] sm:$0xff] }
 0x295   : > { %v1041_v11 = vadd.f32 %v1040_v46, %v919_v44  ;;  %2712 = vrot.lane.b32.xlu1 %v2706_v6, %s3089_s29 }
 0x297   : > { %v1064_v12 = vadd.f32 %v1063_v9, %v1041_v11 }
 0x299   : > { %vm1071_vm13 = vcmp.ge.f32.partialorder %v1064_v12, 0.0  ;;  %v1077_v15 = vmul.f32 0.2, %v1064_v12 }
 0x29b   : > { %v1083_v16 = vsel %vm1071_vm13, %v1064_v12, %v1077_v15 }
 0x29c   : > { %v3526_v19 = vadd.f32 %v1083_v16, %v3392_v53  ;;  %2692 = vrot.lane.b32.xlu2 %v2706_v6, %s3086_s26  ;;  %2722 = vrot.lane.b32.xlu0 %v2706_v6, %s4157_s16  ;;  %v1094_v53 = vld [vmem:[%s4145_s6] sm:$0xff] }
 0x29e   : > { %v2731_v20 = vpack.i.bf16 %v3523_v18, %v3526_v19 }
 0x2a0   : > { %2732 = vrot.lane.b32.xlu1 %v2731_v20, %s3084_s24 }
 0x2a4   : > { %2697 = vrot.lane.b32.xlu2 %v2676_v61, %s3090_s30  ;;  %2742 = vrot.lane.b32.xlu0 %v2731_v20, %s3087_s27 }
 0x2a8   : > { %2737 = vrot.lane.b32.xlu1 %v2731_v20, %s3086_s26 }
 0x2ac   : > { %2702 = vrot.lane.b32.xlu2 %v2676_v61, %s4157_s16  ;;  %1172 = vrot.lane.b32.xlu0 %v3523_v18, %s3088_s28 }
 0x2b0   : > { %1178 = vrot.lane.b32.xlu1 %v3526_v19, %s3088_s28 }
 0x2b4   : > { %2727 = vrot.lane.b32.xlu2 %v2706_v6, %s4155_s25  ;;  %2757 = vrot.lane.b32.xlu0 %v2731_v20, %s3090_s30 }
 0x2b8   : > { %2747 = vrot.lane.b32.xlu1 %v2676_v61, %s4155_s25 }
 0x2bc   : > { %2752 = vrot.lane.b32.xlu2 %v2731_v20, %s3089_s29  ;;  %1285 = vperm.xlu0 %2665, %v1095_v50  }
 0x2c0   : > { %2762 = vrot.lane.b32.xlu1 %v2731_v20, %s4157_s16 }
 0x2c4   : > { %2767 = vrot.lane.b32.xlu2 %v2731_v20, %s4155_s25 }
 0x2c8   : > { %1280 = vperm.xlu1 %2558, %v1094_v53  }
 0x2d6   : > { %v3553_v3 = vpop.permute.xlu2 %2677 }
 0x2d7   : > { %v2680_v42 = vunpack.i.h.bf16 %v3553_v3  ;;  %v2679_v43 = vunpack.i.l.bf16 %v3553_v3 }
 0x2d9   : > { %v1202_v36 = vsel %vm567_vm3, %v2679_v43, %v2680_v42 }
 0x2de   : > { %v1169_v22 = vpop.permute.xlu2 %1168 }
 0x2e6   : > { %v3555_v23 = vpop.permute.xlu2 %2682 }
 0x2e7   : > { %v2685_v58 = vunpack.i.h.bf16 %v3555_v23  ;;  %v2684_v59 = vunpack.i.l.bf16 %v3555_v23 }
 0x2e9   : > { %v1158_v8 = vsel %vm537_vm5, %v2684_v59, %v2685_v58 }
 0x2ee   : > { %v3557_v25 = vpop.permute.xlu2 %2687  ;;  %v3559_v34 = vpop.permute.xlu0 %2672 }
 0x2ef   : > { %v2690_v26 = vunpack.i.h.bf16 %v3557_v25  ;;  %v2689_v29 = vunpack.i.l.bf16 %v3557_v25  ;;  %v3563_v35 = vpop.permute.xlu1 %2667  ;;  %v2675_v1 = vunpack.i.h.bf16 %v3559_v34  ;;  %v2674_v13 = vunpack.i.l.bf16 %v3559_v34 }
 0x2f0   : > { %v2670_v37 = vunpack.i.h.bf16 %v3563_v35  ;;  %v2669_v38 = vunpack.i.l.bf16 %v3563_v35 }
 0x2f1   : > { %v1248_v21 = vsel %vm597_vm1, %v2689_v29, %v2690_v26  ;;  %v1224_v44 = vsel %vm582_vm2, %v2674_v13, %v2675_v1 }
 0x2f2   : > { %1294 = vmatpush.msra.mxu2 %v1248_v21  ;;  %v1246_v41 = vsel %vm597_vm1, %v2669_v38, %v2670_v37 }
 0x2f4   : > { %1295 = vmatpush.msra.mxu2 %v1246_v41 }
 0x2f6   : > { %v3573_v17 = vpop.permute.xlu2 %2692  ;;  %v3575_v33 = vpop.permute.xlu0 %1170 }
 0x2f7   : > { %v2695_v0 = vunpack.i.h.bf16 %v3573_v17  ;;  %v2694_v27 = vunpack.i.l.bf16 %v3573_v17  ;;  %v3581_v28 = vpop.permute.xlu1 %2707  ;;  %v3610_v51 = vsel %vm552_vm4, %v1169_v22, %v3575_v33 }
 0x2f8   : > { %v2710_v30 = vunpack.i.h.bf16 %v3581_v28  ;;  %v2709_v31 = vunpack.i.l.bf16 %v3581_v28 }
 0x2f9   : > { %v1226_v39 = vsel %vm582_vm2, %v2694_v27, %v2695_v0 }
 0x2fa   : > { %1296 = vmatpush.msra.mxu2 %v1226_v39  ;;  %v1204_v45 = vsel %vm567_vm3, %v2709_v31, %v2710_v30  ;;  %v3674_v31 = vld [vmem:[%s4144_s5] sm:$0xff] }
 0x2fc   : > { %1297 = vmatpush.msra.mxu2 %v1224_v44 }
 0x2fe   : > { %v3596_v47 = vpop.permute.xlu2 %2697  ;;  %v1175_v40 = vpop.permute.xlu0 %1174  ;;  %1298 = vmatpush.msra.mxu2 %v1204_v45 }
 0x2ff   : > { %v3598_v48 = vpop.permute.xlu1 %1176  ;;  %v2700_v6 = vunpack.i.h.bf16 %v3596_v47  ;;  %v2699_v7 = vunpack.i.l.bf16 %v3596_v47 }
 0x300   : > { %1299 = vmatpush.msra.mxu2 %v1202_v36  ;;  %v3605_v49 = vsel %vm552_vm4, %v1175_v40, %v3598_v48  ;;  %v3695_v40 = vld [vmem:[%s4144_s5 + $0x10] sm:$0xff] }
 0x301   : > { %v1136_v16 = vsel %vm522_vm6, %v2699_v7, %v2700_v6 }
 0x302   : > { %1300 = vmatpush.msra.mxu2 %v3605_v49 }
 0x304   : > { %1301 = vmatpush.msra.mxu2 %v3610_v51 }
 0x306   : > { %v3613_v52 = vpop.permute.xlu2 %2702  ;;  %v3615_v54 = vpop.permute.xlu0 %2717 }
 0x307   : > { %v3617_v55 = vpop.permute.xlu1 %2712  ;;  %v2720_v2 = vunpack.i.h.bf16 %v3615_v54  ;;  %v2719_v4 = vunpack.i.l.bf16 %v3615_v54  ;;  %v2705_v14 = vunpack.i.h.bf16 %v3613_v52  ;;  %v2704_v15 = vunpack.i.l.bf16 %v3613_v52  ;;  %v1093_v54 = vld [vmem:[%s4144_s5 + $0x18] sm:$0xff] }
 0x308   : > { %v2715_v61 = vunpack.i.h.bf16 %v3617_v55  ;;  %v2714_v63 = vunpack.i.l.bf16 %v3617_v55 }
 0x309   : > { %v1138_v46 = vsel %vm522_vm6, %v2719_v4, %v2720_v2  ;;  %v1114_v38 = vsel %vm510_vm7, %v2704_v15, %v2705_v14 }
 0x30a   : > { %v1160_v32 = vsel %vm537_vm5, %v2714_v63, %v2715_v61 }
 0x30b   : > { %1302 = vmatpush.msra.mxu2 %v1160_v32 }
 0x30d   : > { %1303 = vmatpush.msra.mxu2 %v1158_v8 }
 0x30e   : > { %v2728_v24 = vpop.permute.xlu2 %2727  ;;  %v3633_v60 = vpop.permute.xlu0 %2722 }
 0x30f   : > { %v2730_v9 = vunpack.i.h.bf16 %v2728_v24  ;;  %v2729_v10 = vunpack.i.l.bf16 %v2728_v24  ;;  %v2725_v11 = vunpack.i.h.bf16 %v3633_v60  ;;  %v2724_v12 = vunpack.i.l.bf16 %v3633_v60  ;;  %1304 = vmatpush.msra.mxu2 %v1138_v46 }
 0x311   : > { %1305 = vmatpush.msra.mxu2 %v1136_v16  ;;  %v1116_v20 = vsel %vm510_vm7, %v2724_v12, %v2725_v11  ;;  %v1270_v50 = vsel %vm612_vm0, %v2729_v10, %v2730_v9 }
 0x312   : > { %v3649_v53 = vpop.permute.xlu1 %2732  ;;  %1331 = vmatpush.msrb.mxu0 %v1270_v50 }
 0x313   : > { %v2735_v22 = vunpack.i.h.bf16 %v3649_v53  ;;  %v2734_v29 = vunpack.i.l.bf16 %v3649_v53  ;;  %1306 = vmatpush.msra.mxu2 %v1116_v20 }
 0x315   : > { %1307 = vmatpush.msra.mxu2 %v1114_v38  ;;  %v1249_v21 = vsel %vm597_vm1, %v2690_v26, %v2734_v29  ;;  %v1247_v27 = vsel %vm597_vm1, %v2670_v37, %v2735_v22 }
 0x316   : > { %1340 = vmatpush.msra.mxu1 %v1249_v21  ;;  %v3661_v41 = vpop.permute.xlu2 %2752  ;;  %v3663_v13 = vpop.permute.xlu0 %2742 }
 0x317   : > { %1308 = vmatpush.msra.mxu2 %v3502_v62  ;;  %v2744_v35 = vunpack.i.l.bf16 %v3663_v13  ;;  %v2755_v63 = vunpack.i.h.bf16 %v3661_v41 }
 0x318   : > { %1341 = vmatpush.msra.mxu1 %v1247_v27 }
 0x319   : > { %1309 = vmatpush.msra.mxu2 %v3491_v56  ;;  %v2745_v56 = vunpack.i.h.bf16 %v3663_v13 }
 0x31a   : > { %v3677_v25 = vpop.permute.xlu1 %2737  ;;  %1310 = vmatmul.f32.vlgmr.msra.gmra.mxu2 %v3674_v31 }
 0x31b   : > { %v2740_v62 = vunpack.i.h.bf16 %v3677_v25  ;;  %v2739_v26 = vunpack.i.l.bf16 %v3677_v25  ;;  %v1203_v34 = vsel %vm567_vm3, %v2680_v42, %v2745_v56 }
 0x31d   : > { %v1227_v37 = vsel %vm582_vm2, %v2695_v0, %v2739_v26  ;;  %v1225_v45 = vsel %vm582_vm2, %v2675_v1, %v2740_v62  ;;  %v1205_v0 = vsel %vm567_vm3, %v2710_v30, %v2744_v35  ;;  %v2754_v1 = vunpack.i.l.bf16 %v3661_v41 }
 0x31e   : > { %1342 = vmatpush.msra.mxu1 %v1227_v37  ;;  %v2768_v39 = vpop.permute.xlu2 %2767  ;;  %v3686_v43 = vpop.permute.xlu0 %1172 }
 0x31f   : > { %v2769_v44 = vunpack.i.l.bf16 %v2768_v39  ;;  %v2770_v17 = vunpack.i.h.bf16 %v2768_v39  ;;  %v3720_v3 = vsel %vm552_vm4, %v3575_v33, %v3686_v43  ;;  %v1161_v4 = vsel %vm537_vm5, %v2715_v61, %v2754_v1 }
 0x320   : > { %1343 = vmatpush.msra.mxu1 %v1225_v45  ;;  %v1159_v33 = vsel %vm537_vm5, %v2685_v58, %v2755_v63 }
 0x321   : > { %1423 = vmatpush.msrb.mxu2 %v2769_v44  ;;  %v1271_v36 = vsel %vm612_vm0, %v2730_v9, %v2769_v44 }
 0x322   : > { %v3703_v59 = vpop.permute.xlu1 %1178  ;;  %1313 = vmatmul.f32.gmra.mxu2 %v3695_v40  ;;  %1344 = vmatpush.msra.mxu1 %v1205_v0 }
 0x323   : > { %1377 = vmatpush.msra.mxu3 %v1271_v36  ;;  %1424 = vmatpush.msrb.mxu2 %v2770_v17  ;;  %v3713_v28 = vsel %vm552_vm4, %v3598_v48, %v3703_v59  ;;  %v1091_v48 = vld [vmem:[%s4144_s5 + $0x8] sm:$0xff] }
 0x324   : > { %1345 = vmatpush.msra.mxu1 %v1203_v34 }
 0x326   : > { %1346 = vmatpush.msra.mxu1 %v3713_v28  ;;  %v2758_v30 = vpop.permute.xlu0 %2757 }
 0x327   : > { %v2759_v42 = vunpack.i.l.bf16 %v2758_v30  ;;  %v2760_v7 = vunpack.i.h.bf16 %v2758_v30 }
 0x328   : > { %1347 = vmatpush.msra.mxu1 %v3720_v3 }
 0x329   : > { %v1139_v61 = vsel %vm522_vm6, %v2720_v2, %v2759_v42  ;;  %v1137_v23 = vsel %vm522_vm6, %v2700_v6, %v2760_v7 }
 0x32a   : > { %v2748_v32 = vpop.permute.xlu1 %2747  ;;  %1348 = vmatpush.msra.mxu1 %v1161_v4  ;;  %2453 = vmatmul.msk.f32.vlgmr.msrb.gmra.mxu2 %vm921_vm15, %v1091_v48 }
 0x32b   : > { %v2750_v8 = vunpack.i.h.bf16 %v2748_v32  ;;  %v2749_v24 = vunpack.i.l.bf16 %v2748_v32  ;;  %v1460_v32 = vld [vmem:[%s4147_s8] sm:$0xff] }
 0x32c   : > { %1349 = vmatpush.msra.mxu1 %v1159_v33 }
 0x32d   : > { %v1268_v55 = vsel %vm612_vm0, %v2749_v24, %v2750_v8  ;;  %v1269_v46 = vsel %vm612_vm0, %v2750_v8, %v2770_v17 }
 0x32e   : > { %1332 = vmatpush.msrb.mxu0 %v1268_v55  ;;  %1350 = vmatpush.msra.mxu1 %v1139_v61  ;;  %v1286_v15 = vpop.permute.xlu0 %1285 }
 0x32f   : > { %1378 = vmatpush.msra.mxu3 %v1269_v46  ;;  %2449 = vmatmul.msk.f32.vlgmr.msrb.gmra.mxu0 %vm921_vm15, %v1091_v48 }
 0x330   : > { %1386 = vmatpush.msra.mxu0 %v2734_v29  ;;  %1351 = vmatpush.msra.mxu1 %v1137_v23 }
 0x331   : > { %2451 = vmatmul.msk.f32.vlgmr.msra.gmra.mxu3 %vm921_vm15, %v1091_v48 }
 0x332   : > { %1387 = vmatpush.msra.mxu0 %v2735_v22  ;;  %v2763_v58 = vpop.permute.xlu1 %2762  ;;  %2454 = vmatmul.msk.f32.gmra.mxu2 %vm921_vm15, %v1093_v54 }
 0x333   : > { %v2765_v2 = vunpack.i.h.bf16 %v2763_v58  ;;  %v2764_v47 = vunpack.i.l.bf16 %v2763_v58 }
 0x334   : > { %1388 = vmatpush.msra.mxu0 %v2739_v26 }
 0x335   : > { %v1117_v6 = vsel %vm510_vm7, %v2725_v11, %v2764_v47  ;;  %v1115_v9 = vsel %vm510_vm7, %v2705_v14, %v2765_v2 }
 0x336   : > { %1389 = vmatpush.msra.mxu0 %v2740_v62  ;;  %1352 = vmatpush.msra.mxu1 %v1117_v6 }
 0x337   : > { %2450 = vmatmul.msk.f32.gmra.mxu0 %vm921_vm15, %v1093_v54 }
 0x338   : > { %1390 = vmatpush.msra.mxu0 %v2744_v35  ;;  %1353 = vmatpush.msra.mxu1 %v1115_v9 }
 0x339   : > { %2452 = vmatmul.msk.f32.gmra.mxu3 %vm921_vm15, %v1093_v54 }
 0x33a   : > { %1391 = vmatpush.msra.mxu0 %v2745_v56  ;;  %1354 = vmatpush.msra.mxu1 %v3505_v5  ;;  %v1281_v5 = vpop.permute.xlu1 %1280 }
 0x33c   : > { %1392 = vmatpush.msra.mxu0 %v3703_v59  ;;  %1355 = vmatpush.msra.mxu1 %v3494_v57 }
 0x33d   : > { %1356 = vmatmul.f32.vlgmr.msra.gmra.mxu1 %v3674_v31 }
 0x33e   : > { %1393 = vmatpush.msra.mxu0 %v3686_v43 }
 0x340   : > { %1394 = vmatpush.msra.mxu0 %v2754_v1 }
 0x342   : > { %1395 = vmatpush.msra.mxu0 %v2755_v63 }
 0x344   : > { %1396 = vmatpush.msra.mxu0 %v2759_v42 }
 0x345   : > { %1359 = vmatmul.f32.gmra.mxu1 %v3695_v40 }
 0x346   : > { %1397 = vmatpush.msra.mxu0 %v2760_v7 }
 0x348   : > { %1398 = vmatpush.msra.mxu0 %v2764_v47 }
 0x34a   : > { %1399 = vmatpush.msra.mxu0 %v2765_v2 }
 0x34c   : > { %1400 = vmatpush.msra.mxu0 %v3526_v19 }
 0x34e   : > { %1401 = vmatpush.msra.mxu0 %v3523_v18 }
 0x34f   : > { %1402 = vmatmul.f32.vlgmr.msra.gmra.mxu0 %v3674_v31 }
 0x357   : > { %1405 = vmatmul.f32.gmra.mxu0 %v3695_v40 }
 0x39d   : > { %v1311_v57 = vpop.f32.mrf.mxu2 }
 0x39e   : > { %v1312_v52 = vadd.f32 %v1311_v57, %v1281_v5 }
 0x3a5   : > { %v1314_v12 = vpop.f32.mrf.mxu2 }
 0x3a6   : > { %v1315_v19 = vadd.f32 %v1314_v12, %v1286_v15 }
 0x3ac   : > { %v1334_v60 = vpop.f32.mrf.mxu0 }
 0x3ad   : > { %v1335_v10 = vadd.f32 %v1334_v60, %v1312_v52  ;;  %v1426_v39 = vpop.f32.mrf.mxu2 }
 0x3af   : > { %vm1432_vm14 = vcmp.ge.f32.partialorder %v1335_v10, 0.0  ;;  %v1438_v11 = vmul.f32 0.2, %v1335_v10 }
 0x3b1   : > { %v1444_v14 = vsel %vm1432_vm14, %v1335_v10, %v1438_v11 }
 0x3b2   : > { %v3772_v16 = vadd.f32 %v1444_v14, %v3610_v51 }
 0x3b4   : > { %v1337_v20 = vpop.f32.mrf.mxu0  ;;  %1516 = vrot.lane.b32.xlu2 %v3772_v16, %s3088_s28  ;;  %v1380_v53 = vpop.f32.mrf.mxu3 }
 0x3b5   : > { %v1338_v18 = vadd.f32 %v1337_v20, %v1315_v19  ;;  %v1429_v1 = vpop.f32.mrf.mxu2 }
 0x3b7   : > { %vm1435_vm8 = vcmp.ge.f32.partialorder %v1338_v18, 0.0  ;;  %v1441_v50 = vmul.f32 0.2, %v1338_v18 }
 0x3b9   : > { %v1447_v22 = vsel %vm1435_vm8, %v1338_v18, %v1441_v50 }
 0x3ba   : > { %v3777_v29 = vadd.f32 %v1447_v22, %v3605_v49  ;;  %v1357_v38 = vpop.f32.mrf.mxu1 }
 0x3bb   : > { %v1358_v21 = vadd.f32 %v1357_v38, %v1281_v5 }
 0x3bc   : > { %1522 = vrot.lane.b32.xlu2 %v3777_v29, %s3088_s28  ;;  %v1383_v25 = vpop.f32.mrf.mxu3 }
 0x3bd   : > { %v1381_v51 = vadd.f32 %v1380_v53, %v1358_v21 }
 0x3bf   : > { %vm1433_vm9 = vcmp.ge.f32.partialorder %v1381_v51, 0.0  ;;  %v1439_v41 = vmul.f32 0.2, %v1381_v51 }
 0x3c1   : > { %v1445_v13 = vsel %vm1433_vm9, %v1381_v51, %v1439_v41 }
 0x3c2   : > { %v3782_v27 = vadd.f32 %v1445_v13, %v3720_v3  ;;  %v1360_v31 = vpop.f32.mrf.mxu1 }
 0x3c3   : > { %v1361_v62 = vadd.f32 %v1360_v31, %v1286_v15 }
 0x3c4   : > { %1518 = vrot.lane.b32.xlu0 %v3782_v27, %s3088_s28 }
 0x3c5   : > { %v1384_v49 = vadd.f32 %v1383_v25, %v1361_v62 }
 0x3c7   : > { %vm1436_vm10 = vcmp.ge.f32.partialorder %v1384_v49, 0.0  ;;  %v1442_v26 = vmul.f32 0.2, %v1384_v49 }
 0x3c9   : > { %v1448_v35 = vsel %vm1436_vm10, %v1384_v49, %v1442_v26 }
 0x3ca   : > { %v3787_v37 = vadd.f32 %v1448_v35, %v3713_v28 }
 0x3cc   : > { %v1403_v56 = vpop.f32.mrf.mxu0  ;;  %1524 = vrot.lane.b32.xlu0 %v3787_v37, %s3088_s28  ;;  %v2786_v44 = vpack.i.bf16 %v3787_v37, %v3777_v29 }
 0x3cd   : > { %v1404_v45 = vadd.f32 %v1403_v56, %v1281_v5 }
 0x3ce   : > { %2787 = vrot.lane.b32.xlu2 %v2786_v44, %s3084_s24 }
 0x3cf   : > { %v1427_v40 = vadd.f32 %v1426_v39, %v1404_v45 }
 0x3d1   : > { %vm1434_vm11 = vcmp.ge.f32.partialorder %v1427_v40, 0.0  ;;  %v1440_v17 = vmul.f32 0.2, %v1427_v40 }
 0x3d3   : > { %v1446_v0 = vsel %vm1434_vm11, %v1427_v40, %v1440_v17 }
 0x3d4   : > { %v1452_v36 = vadd.f32 %v1446_v0, %v3686_v43  ;;  %v1406_v34 = vpop.f32.mrf.mxu0  ;;  %v2846_v43 = vpack.i.bf16 %v3782_v27, %v3772_v16 }
 0x3d5   : > { %v1407_v28 = vadd.f32 %v1406_v34, %v1286_v15 }
 0x3d6   : > { %2792 = vrot.lane.b32.xlu2 %v2786_v44, %s3086_s26  ;;  %v2771_v30 = vpack.i.bf16 %v1452_v36, %v3782_v27 }
 0x3d7   : > { %v1430_v63 = vadd.f32 %v1429_v1, %v1407_v28 }
 0x3d8   : > { %2772 = vrot.lane.b32.xlu1 %v2771_v30, %s3084_s24 }
 0x3d9   : > { %vm1437_vm12 = vcmp.ge.f32.partialorder %v1430_v63, 0.0  ;;  %v1443_v3 = vmul.f32 0.2, %v1430_v63 }
 0x3db   : > { %v1449_v42 = vsel %vm1437_vm12, %v1430_v63, %v1443_v3 }
 0x3dc   : > { %v1455_v4 = vadd.f32 %v1449_v42, %v3703_v59  ;;  %v1461_v59 = vld [vmem:[%s4147_s8 + $0x8] sm:$0xff] }
 0x3de   : > { %2797 = vrot.lane.b32.xlu2 %v2786_v44, %s3087_s27  ;;  %v2806_v48 = vpack.i.bf16 %v3772_v16, %v1455_v4 }
 0x3e0   : > { %2777 = vrot.lane.b32.xlu1 %v2771_v30, %s3086_s26  ;;  %2807 = vrot.lane.b32.xlu0 %v2806_v48, %s3084_s24 }
 0x3e6   : > { %2802 = vrot.lane.b32.xlu2 %v2786_v44, %s3089_s29 }
 0x3e8   : > { %2782 = vrot.lane.b32.xlu1 %v2771_v30, %s3087_s27  ;;  %2812 = vrot.lane.b32.xlu0 %v2806_v48, %s3086_s26 }
 0x3ee   : > { %2827 = vrot.lane.b32.xlu2 %v2786_v44, %s3090_s30 }
 0x3f0   : > { %1520 = vrot.lane.b32.xlu1 %v1452_v36, %s3088_s28  ;;  %2817 = vrot.lane.b32.xlu0 %v2806_v48, %s3087_s27 }
 0x3f6   : > { %2847 = vrot.lane.b32.xlu2 %v2846_v43, %s4157_s16 }
 0x3f8   : > { %1526 = vrot.lane.b32.xlu1 %v1455_v4, %s3088_s28  ;;  %2832 = vrot.lane.b32.xlu0 %v2806_v48, %s3089_s29 }
 0x3fe   : > { %2862 = vrot.lane.b32.xlu2 %v2771_v30, %s4155_s25 }
 0x400   : > { %2822 = vrot.lane.b32.xlu1 %v2771_v30, %s3089_s29  ;;  %2837 = vrot.lane.b32.xlu0 %v2846_v43, %s3090_s30 }
 0x408   : > { %2842 = vrot.lane.b32.xlu1 %v2786_v44, %s4157_s16  ;;  %2852 = vrot.lane.b32.xlu0 %v2786_v44, %s4155_s25 }
 0x40e   : > { %v3826_v7 = vpop.permute.xlu2 %1516 }
 0x410   : > { %2857 = vrot.lane.b32.xlu1 %v2806_v48, %s4155_s25  ;;  %1623 = vperm.xlu0 %2665, %v1461_v59  }
 0x416   : > { %v1523_v8 = vpop.permute.xlu2 %1522 }
 0x418   : > { %1618 = vperm.xlu1 %2558, %v1460_v32  }
 0x428   : > { %v2788_v24 = vpop.permute.xlu2 %2787 }
 0x429   : > { %v2790_v33 = vunpack.i.h.bf16 %v2788_v24  ;;  %v2789_v55 = vunpack.i.l.bf16 %v2788_v24 }
 0x42b   : > { %v1590_v61 = vsel %vm597_vm1, %v2789_v55, %v2790_v33 }
 0x42c   : > { %1632 = vmatpush.msrb.mxu3 %v1590_v61 }
 0x430   : > { %v2793_v58 = vpop.permute.xlu2 %2792 }
 0x431   : > { %v2795_v2 = vunpack.i.h.bf16 %v2793_v58  ;;  %v2794_v47 = vunpack.i.l.bf16 %v2793_v58 }
 0x433   : > { %v1570_v14 = vsel %vm582_vm2, %v2794_v47, %v2795_v2 }
 0x436   : > { %v3829_v46 = vpop.permute.xlu0 %1518 }
 0x437   : > { %v3849_v34 = vsel %vm552_vm4, %v3826_v7, %v3829_v46 }
 0x438   : > { %v2798_v12 = vpop.permute.xlu2 %2797 }
 0x439   : > { %v2800_v19 = vunpack.i.h.bf16 %v2798_v12  ;;  %v2799_v20 = vunpack.i.l.bf16 %v2798_v12 }
 0x43b   : > { %v1550_v13 = vsel %vm567_vm3, %v2799_v20, %v2800_v19 }
 0x43e   : > { %v1525_v23 = vpop.permute.xlu0 %1524 }
 0x43f   : > { %v3842_v0 = vsel %vm552_vm4, %v1523_v8, %v1525_v23 }
 0x440   : > { %v2803_v25 = vpop.permute.xlu2 %2802 }
 0x441   : > { %v2805_v40 = vunpack.i.h.bf16 %v2803_v25  ;;  %v2804_v17 = vunpack.i.l.bf16 %v2803_v25 }
 0x443   : > { %v1510_v63 = vsel %vm537_vm5, %v2804_v17, %v2805_v40 }
 0x448   : > { %v2828_v42 = vpop.permute.xlu2 %2827 }
 0x449   : > { %v2830_v43 = vunpack.i.h.bf16 %v2828_v42  ;;  %v2829_v7 = vunpack.i.l.bf16 %v2828_v42 }
 0x44a   : > { %v2773_v54 = vpop.permute.xlu1 %2772 }
 0x44b   : > { %v2775_v57 = vunpack.i.h.bf16 %v2773_v54  ;;  %v2774_v5 = vunpack.i.l.bf16 %v2773_v54  ;;  %v1489_v58 = vsel %vm522_vm6, %v2829_v7, %v2830_v43 }
 0x44d   : > { %v1589_v15 = vsel %vm597_vm1, %v2774_v5, %v2775_v57 }
 0x452   : > { %v2778_v6 = vpop.permute.xlu1 %2777  ;;  %v2808_v9 = vpop.permute.xlu0 %2807 }
 0x453   : > { %v2810_v52 = vunpack.i.h.bf16 %v2808_v9  ;;  %v2809_v60 = vunpack.i.l.bf16 %v2808_v9  ;;  %v2780_v53 = vunpack.i.h.bf16 %v2778_v6  ;;  %v2779_v22 = vunpack.i.l.bf16 %v2778_v6 }
 0x455   : > { %v1588_v10 = vsel %vm597_vm1, %v2810_v52, %v2774_v5  ;;  %v1591_v11 = vsel %vm597_vm1, %v2790_v33, %v2809_v60  ;;  %v1569_v31 = vsel %vm582_vm2, %v2779_v22, %v2780_v53 }
 0x456   : > { %1633 = vmatpush.msrb.mxu3 %v1588_v10  ;;  %1678 = vmatpush.msra.mxu2 %v1591_v11 }
 0x458   : > { %1634 = vmatpush.msrb.mxu3 %v1570_v14  ;;  %1679 = vmatpush.msra.mxu2 %v1589_v15 }
 0x45a   : > { %v2783_v18 = vpop.permute.xlu1 %2782  ;;  %v2813_v50 = vpop.permute.xlu0 %2812 }
 0x45b   : > { %v2815_v38 = vunpack.i.h.bf16 %v2813_v50  ;;  %v2814_v21 = vunpack.i.l.bf16 %v2813_v50  ;;  %v2785_v26 = vunpack.i.h.bf16 %v2783_v18  ;;  %v2784_v35 = vunpack.i.l.bf16 %v2783_v18 }
 0x45d   : > { %v1568_v51 = vsel %vm582_vm2, %v2815_v38, %v2779_v22  ;;  %v1571_v41 = vsel %vm582_vm2, %v2795_v2, %v2814_v21  ;;  %v1549_v36 = vsel %vm567_vm3, %v2784_v35, %v2785_v26 }
 0x45e   : > { %1635 = vmatpush.msrb.mxu3 %v1568_v51  ;;  %1680 = vmatpush.msra.mxu2 %v1571_v41 }
 0x460   : > { %1636 = vmatpush.msrb.mxu3 %v1550_v13  ;;  %1681 = vmatpush.msra.mxu2 %v1569_v31 }
 0x462   : > { %v1521_v62 = vpop.permute.xlu1 %1520  ;;  %v2818_v49 = vpop.permute.xlu0 %2817 }
 0x463   : > { %v2820_v39 = vunpack.i.h.bf16 %v2818_v49  ;;  %v2819_v56 = vunpack.i.l.bf16 %v2818_v49  ;;  %v3859_v4 = vsel %vm552_vm4, %v3829_v46, %v1521_v62  ;;  %v2848_v46 = vpop.permute.xlu2 %2847 }
 0x464   : > { %v2850_v47 = vunpack.i.h.bf16 %v2848_v46  ;;  %v2849_v6 = vunpack.i.l.bf16 %v2848_v46 }
 0x465   : > { %v1548_v44 = vsel %vm567_vm3, %v2820_v39, %v2784_v35  ;;  %v1551_v45 = vsel %vm567_vm3, %v2800_v19, %v2819_v56  ;;  %v1456_v19 = vld [vmem:[%s4146_s7] sm:$0xff] }
 0x466   : > { %1637 = vmatpush.msrb.mxu3 %v1548_v44  ;;  %1682 = vmatpush.msra.mxu2 %v1551_v45  ;;  %v1474_v14 = vsel %vm510_vm7, %v2849_v6, %v2850_v47 }
 0x468   : > { %1638 = vmatpush.msrb.mxu3 %v3842_v0  ;;  %1683 = vmatpush.msra.mxu2 %v1549_v36 }
 0x46a   : > { %v1527_v1 = vpop.permute.xlu1 %1526  ;;  %v2833_v28 = vpop.permute.xlu0 %2832  ;;  %1639 = vmatpush.msrb.mxu3 %v3849_v34 }
 0x46b   : > { %v2834_v30 = vunpack.i.l.bf16 %v2833_v28  ;;  %v3854_v3 = vsel %vm552_vm4, %v1525_v23, %v1527_v1  ;;  %v2835_v8 = vunpack.i.h.bf16 %v2833_v28  ;;  %v2863_v15 = vpop.permute.xlu2 %2862 }
 0x46c   : > { %1640 = vmatpush.msrb.mxu3 %v1510_v63  ;;  %1684 = vmatpush.msra.mxu2 %v3854_v3  ;;  %v2865_v18 = vunpack.i.h.bf16 %v2863_v15  ;;  %v2864_v50 = vunpack.i.l.bf16 %v2863_v15 }
 0x46d   : > { %v1511_v48 = vsel %vm537_vm5, %v2805_v40, %v2834_v30 }
 0x46e   : > { %1685 = vmatpush.msra.mxu2 %v3859_v4 }
 0x470   : > { %1686 = vmatpush.msra.mxu2 %v1511_v48 }
 0x472   : > { %v2823_v59 = vpop.permute.xlu1 %2822  ;;  %v2838_v32 = vpop.permute.xlu0 %2837 }
 0x473   : > { %v2825_v24 = vunpack.i.h.bf16 %v2823_v59  ;;  %v2824_v33 = vunpack.i.l.bf16 %v2823_v59  ;;  %v2840_v55 = vunpack.i.h.bf16 %v2838_v32  ;;  %v2839_v61 = vunpack.i.l.bf16 %v2838_v32 }
 0x475   : > { %v1508_v23 = vsel %vm537_vm5, %v2835_v8, %v2824_v33  ;;  %v1509_v54 = vsel %vm537_vm5, %v2824_v33, %v2825_v24  ;;  %v1488_v2 = vsel %vm522_vm6, %v2839_v61, %v2840_v55 }
 0x476   : > { %1641 = vmatpush.msrb.mxu3 %v1508_v23  ;;  %1687 = vmatpush.msra.mxu2 %v1509_v54 }
 0x478   : > { %1642 = vmatpush.msrb.mxu3 %v1489_v58  ;;  %1688 = vmatpush.msra.mxu2 %v2830_v43 }
 0x47a   : > { %v2843_v9 = vpop.permute.xlu1 %2842  ;;  %v2853_v57 = vpop.permute.xlu0 %2852  ;;  %1643 = vmatpush.msrb.mxu3 %v1488_v2  ;;  %1689 = vmatpush.msra.mxu2 %v2840_v55 }
 0x47b   : > { %v2845_v5 = vunpack.i.h.bf16 %v2843_v9  ;;  %v2844_v52 = vunpack.i.l.bf16 %v2843_v9  ;;  %v2855_v60 = vunpack.i.h.bf16 %v2853_v57  ;;  %v2854_v10 = vunpack.i.l.bf16 %v2853_v57 }
 0x47d   : > { %1690 = vmatpush.msra.mxu2 %v2845_v5  ;;  %v1475_v11 = vsel %vm510_vm7, %v2844_v52, %v2845_v5  ;;  %v1610_v12 = vsel %vm612_vm0, %v2854_v10, %v2855_v60 }
 0x47e   : > { %1644 = vmatpush.msrb.mxu3 %v1475_v11  ;;  %1669 = vmatpush.msrb.mxu1 %v1610_v12 }
 0x47f   : > { %1691 = vmatpush.msra.mxu2 %v2850_v47 }
 0x480   : > { %1645 = vmatpush.msrb.mxu3 %v1474_v14 }
 0x481   : > { %1692 = vmatpush.msra.mxu2 %v3787_v37  ;;  %v1457_v37 = vld [vmem:[%s4146_s7 + $0x8] sm:$0xff] }
 0x482   : > { %v2858_v20 = vpop.permute.xlu1 %2857  ;;  %1646 = vmatpush.msrb.mxu3 %v3777_v29  ;;  %v1609_v29 = vsel %vm612_vm0, %v2864_v50, %v2865_v18  ;;  %v1624_v44 = vpop.permute.xlu0 %1623 }
 0x483   : > { %v2860_v53 = vunpack.i.h.bf16 %v2858_v20  ;;  %v2859_v22 = vunpack.i.l.bf16 %v2858_v20  ;;  %1693 = vmatpush.msra.mxu2 %v3782_v27  ;;  %v1459_v27 = vld [vmem:[%s4146_s7 + $0x18] sm:$0xff] }
 0x484   : > { %1647 = vmatpush.msrb.mxu3 %v3772_v16  ;;  %1694 = vmatmul.f32.vlgmr.msra.gmra.mxu2 %v1456_v19  ;;  %v1458_v16 = vld [vmem:[%s4146_s7 + $0x10] sm:$0xff] }
 0x485   : > { %1648 = vmatmul.f32.vlgmr.msrb.gmra.mxu3 %v1456_v19  ;;  %v1608_v38 = vsel %vm612_vm0, %v2860_v53, %v2864_v50  ;;  %v1611_v21 = vsel %vm612_vm0, %v2855_v60, %v2859_v22 }
 0x486   : > { %1670 = vmatpush.msrb.mxu1 %v1608_v38  ;;  %1715 = vmatpush.msrb.mxu0 %v1611_v21 }
 0x487   : > { %2455 = vmatmul.msk.f32.vlgmr.msrb.gmra.mxu1 %vm921_vm15, %v1457_v37 }
 0x488   : > { %1716 = vmatpush.msrb.mxu0 %v1609_v29 }
 0x489   : > { %2457 = vmatmul.msk.f32.vlgmr.msrb.gmra.mxu0 %vm921_vm15, %v1457_v37 }
 0x48a   : > { %v1619_v13 = vpop.permute.xlu1 %1618 }
 0x48c   : > { %1697 = vmatmul.f32.gmra.mxu2 %v1458_v16 }
 0x48d   : > { %1651 = vmatmul.f32.gmra.mxu3 %v1458_v16 }
 0x48f   : > { %2456 = vmatmul.msk.f32.gmra.mxu1 %vm921_vm15, %v1459_v27 }
 0x491   : > { %2458 = vmatmul.msk.f32.gmra.mxu0 %vm921_vm15, %v1459_v27 }
 0x504   : > { %v1672_v41 = vpop.f32.mrf.mxu1 }
 0x506   : > { %v1718_v51 = vpop.f32.mrf.mxu0 }
 0x507   : > { %v1695_v31 = vpop.f32.mrf.mxu2 }
 0x508   : > { %v1696_v25 = vadd.f32 %v1695_v31, %v1619_v13  ;;  %v1649_v62 = vpop.f32.mrf.mxu3 }
 0x509   : > { %v1650_v49 = vadd.f32 %v1649_v62, %v1619_v13 }
 0x50a   : > { %v1719_v26 = vadd.f32 %v1718_v51, %v1696_v25 }
 0x50b   : > { %v1673_v35 = vadd.f32 %v1672_v41, %v1650_v49 }
 0x50c   : > { %vm1725_vm13 = vcmp.ge.f32.partialorder %v1719_v26, 0.0  ;;  %v1729_v39 = vmul.f32 0.2, %v1719_v26  ;;  %v1675_v42 = vpop.f32.mrf.mxu1 }
 0x50d   : > { %vm1724_vm14 = vcmp.ge.f32.partialorder %v1673_v35, 0.0  ;;  %v1728_v56 = vmul.f32 0.2, %v1673_v35 }
 0x50e   : > { %v1733_v45 = vsel %vm1725_vm13, %v1719_v26, %v1729_v39  ;;  %v1721_v1 = vpop.f32.mrf.mxu0 }
 0x50f   : > { %v3894_v40 = vadd.f32 %v1733_v45, %v3859_v4  ;;  %v1732_v17 = vsel %vm1724_vm14, %v1673_v35, %v1728_v56  ;;  %v1698_v36 = vpop.f32.mrf.mxu2 }
 0x510   : > { %v3897_v28 = vadd.f32 %v1732_v17, %v3849_v34  ;;  %v1699_v30 = vadd.f32 %v1698_v36, %v1624_v44  ;;  %v1652_v63 = vpop.f32.mrf.mxu3 }
 0x511   : > { %v1653_v48 = vadd.f32 %v1652_v63, %v1624_v44 }
 0x512   : > { %v1722_v43 = vadd.f32 %v1721_v1, %v1699_v30  ;;  %1792 = vrot.lane.b32.xlu1 %v3897_v28, %s3088_s28  ;;  %v2871_v59 = vpack.i.bf16 %v3894_v40, %v3897_v28 }
 0x513   : > { %v1676_v32 = vadd.f32 %v1675_v42, %v1653_v48 }
 0x514   : > { %vm1727_vm8 = vcmp.ge.f32.partialorder %v1722_v43, 0.0  ;;  %v1731_v4 = vmul.f32 0.2, %v1722_v43  ;;  %2872 = vrot.lane.b32.xlu2 %v2871_v59, %s3086_s26  ;;  %2867 = vrot.lane.b32.xlu0 %v2871_v59, %s3084_s24 }
 0x515   : > { %vm1726_vm9 = vcmp.ge.f32.partialorder %v1676_v32, 0.0  ;;  %v1730_v34 = vmul.f32 0.2, %v1676_v32 }
 0x516   : > { %v1735_v7 = vsel %vm1727_vm8, %v1722_v43, %v1731_v4 }
 0x517   : > { %v3906_v8 = vadd.f32 %v1735_v7, %v3854_v3  ;;  %v1734_v24 = vsel %vm1726_vm9, %v1676_v32, %v1730_v34  ;;  %v1744_v3 = vld [vmem:[%s4149_s10] sm:$0xff] }
 0x518   : > { %v3909_v33 = vadd.f32 %v1734_v24, %v3842_v0  ;;  %v1745_v0 = vld [vmem:[%s4149_s10 + $0x8] sm:$0xff] }
 0x51a   : > { %2877 = vrot.lane.b32.xlu1 %v2871_v59, %s3087_s27  ;;  %v2896_v55 = vpack.i.bf16 %v3906_v8, %v3909_v33 }
 0x51c   : > { %1796 = vrot.lane.b32.xlu2 %v3909_v33, %s3088_s28  ;;  %2897 = vrot.lane.b32.xlu0 %v2896_v55, %s3087_s27 }
 0x522   : > { %2887 = vrot.lane.b32.xlu1 %v2896_v55, %s3086_s26 }
 0x524   : > { %2882 = vrot.lane.b32.xlu2 %v2896_v55, %s3084_s24  ;;  %1798 = vrot.lane.b32.xlu0 %v3906_v8, %s3088_s28 }
 0x52a   : > { %2892 = vrot.lane.b32.xlu1 %v2871_v59, %s3089_s29 }
 0x52c   : > { %1794 = vrot.lane.b32.xlu2 %v3894_v40, %s3088_s28  ;;  %2902 = vrot.lane.b32.xlu0 %v2896_v55, %s3089_s29 }
 0x532   : > { %2917 = vrot.lane.b32.xlu1 %v2896_v55, %s4157_s16 }
 0x534   : > { %2912 = vrot.lane.b32.xlu2 %v2896_v55, %s3090_s30  ;;  %2907 = vrot.lane.b32.xlu0 %v2871_v59, %s3090_s30 }
 0x53a   : > { %2932 = vrot.lane.b32.xlu1 %v2871_v59, %s4155_s25 }
 0x53c   : > { %2922 = vrot.lane.b32.xlu2 %v2896_v55, %s4155_s25  ;;  %2927 = vrot.lane.b32.xlu0 %v2871_v59, %s4157_s16  ;;  %v1741_v55 = vld [vmem:[%s4148_s9 + $0x8] sm:$0xff]  ;;  %s4158_s25 = smov 86  }
 0x544   : > { %1869 = vperm.xlu2 %2559, %v1745_v0   ;;  %1864 = vperm.xlu0 %2665, %v1744_v3  }
 0x56e   : > { %v2873_v61 = vpop.permute.xlu2 %2872 }
 0x56f   : > { %v2875_v14 = vunpack.i.h.bf16 %v2873_v61  ;;  %v2874_v15 = vunpack.i.l.bf16 %v2873_v61 }
 0x571   : > { %v1828_v27 = vsel %vm582_vm2, %v2874_v15, %v2875_v14 }
 0x576   : > { %v1797_v23 = vpop.permute.xlu2 %1796 }
 0x57e   : > { %v2883_v54 = vpop.permute.xlu2 %2882 }
 0x57f   : > { %v2885_v46 = vunpack.i.h.bf16 %v2883_v54  ;;  %v2884_v58 = vunpack.i.l.bf16 %v2883_v54 }
 0x581   : > { %1924 = vmatpush.msra.mxu0 %v2885_v46  ;;  %v1843_v2 = vsel %vm597_vm1, %v2884_v58, %v2885_v46  ;;  %v1740_v46 = vld [vmem:[%s4148_s9] sm:$0xff]  ;;  %v1743_v58 = vld [vmem:[%s4148_s9 + $0x18] sm:$0xff] }
 0x582   : > { %1878 = vmatpush.msra.mxu1 %v1843_v2 }
 0x584   : > { %v1793_v47 = vpop.permute.xlu1 %1792 }
 0x586   : > { %v3938_v6 = vpop.permute.xlu2 %1794  ;;  %v2868_v9 = vpop.permute.xlu0 %2867 }
 0x587   : > { %v2870_v57 = vunpack.i.h.bf16 %v2868_v9  ;;  %v2869_v5 = vunpack.i.l.bf16 %v2868_v9  ;;  %v3957_v56 = vsel %vm552_vm4, %v1793_v47, %v3938_v6 }
 0x589   : > { %1925 = vmatpush.msra.mxu0 %v2870_v57  ;;  %v1842_v52 = vsel %vm597_vm1, %v2869_v5, %v2870_v57 }
 0x58a   : > { %1879 = vmatpush.msra.mxu1 %v1842_v52 }
 0x58c   : > { %v2878_v60 = vpop.permute.xlu1 %2877 }
 0x58d   : > { %v2880_v29 = vunpack.i.h.bf16 %v2878_v60  ;;  %v2879_v16 = vunpack.i.l.bf16 %v2878_v60 }
 0x58e   : > { %v2913_v10 = vpop.permute.xlu2 %2912  ;;  %v2898_v11 = vpop.permute.xlu0 %2897 }
 0x58f   : > { %v2900_v18 = vunpack.i.h.bf16 %v2898_v11  ;;  %v2899_v22 = vunpack.i.l.bf16 %v2898_v11  ;;  %v1814_v31 = vsel %vm567_vm3, %v2879_v16, %v2880_v29  ;;  %v2915_v44 = vunpack.i.h.bf16 %v2913_v10 }
 0x590   : > { %v2914_v45 = vunpack.i.l.bf16 %v2913_v10 }
 0x591   : > { %v1815_v41 = vsel %vm567_vm3, %v2899_v22, %v2900_v18 }
 0x592   : > { %v1773_v63 = vsel %vm522_vm6, %v2914_v45, %v2915_v44 }
 0x594   : > { %v2888_v12 = vpop.permute.xlu1 %2887 }
 0x595   : > { %v2890_v19 = vunpack.i.h.bf16 %v2888_v12  ;;  %v2889_v20 = vunpack.i.l.bf16 %v2888_v12 }
 0x596   : > { %v2923_v50 = vpop.permute.xlu2 %2922  ;;  %v3941_v53 = vpop.permute.xlu0 %1798 }
 0x597   : > { %v2925_v37 = vunpack.i.h.bf16 %v2923_v50  ;;  %v2924_v38 = vunpack.i.l.bf16 %v2923_v50  ;;  %1926 = vmatpush.msra.mxu0 %v2890_v19  ;;  %v1829_v21 = vsel %vm582_vm2, %v2889_v20, %v2890_v19  ;;  %v3951_v26 = vsel %vm552_vm4, %v1797_v23, %v3941_v53 }
 0x598   : > { %1880 = vmatpush.msra.mxu1 %v1829_v21 }
 0x599   : > { %1927 = vmatpush.msra.mxu0 %v2875_v14  ;;  %1961 = vmatpush.msrb.mxu2 %v2925_v37  ;;  %v1857_v51 = vsel %vm612_vm0, %v2924_v38, %v2925_v37 }
 0x59a   : > { %1881 = vmatpush.msra.mxu1 %v1828_v27  ;;  %1915 = vmatpush.msra.mxu3 %v1857_v51 }
 0x59b   : > { %1928 = vmatpush.msra.mxu0 %v2900_v18 }
 0x59c   : > { %v2893_v13 = vpop.permute.xlu1 %2892  ;;  %1882 = vmatpush.msra.mxu1 %v1815_v41 }
 0x59d   : > { %1929 = vmatpush.msra.mxu0 %v2880_v29  ;;  %v2895_v35 = vunpack.i.h.bf16 %v2893_v13  ;;  %v2894_v39 = vunpack.i.l.bf16 %v2893_v13 }
 0x59e   : > { %v2903_v25 = vpop.permute.xlu0 %2902  ;;  %1883 = vmatpush.msra.mxu1 %v1814_v31  ;;  %v1870_v11 = vpop.permute.xlu2 %1869 }
 0x59f   : > { %v2905_v62 = vunpack.i.h.bf16 %v2903_v25  ;;  %v2904_v49 = vunpack.i.l.bf16 %v2903_v25  ;;  %1930 = vmatpush.msra.mxu0 %v3941_v53  ;;  %v1786_v1 = vsel %vm537_vm5, %v2894_v39, %v2895_v35 }
 0x5a0   : > { %1884 = vmatpush.msra.mxu1 %v3951_v26 }
 0x5a1   : > { %1931 = vmatpush.msra.mxu0 %v3938_v6  ;;  %v1787_v17 = vsel %vm537_vm5, %v2904_v49, %v2905_v62 }
 0x5a2   : > { %1885 = vmatpush.msra.mxu1 %v3957_v56 }
 0x5a3   : > { %1932 = vmatpush.msra.mxu0 %v2905_v62  ;;  %v1990_v62 = vld [vmem:[%s4151_s12] sm:$0xff] }
 0x5a4   : > { %v2918_v36 = vpop.permute.xlu1 %2917  ;;  %1886 = vmatpush.msra.mxu1 %v1787_v17 }
 0x5a5   : > { %1933 = vmatpush.msra.mxu0 %v2895_v35  ;;  %v2920_v42 = vunpack.i.h.bf16 %v2918_v36  ;;  %v2919_v48 = vunpack.i.l.bf16 %v2918_v36 }
 0x5a6   : > { %v2908_v30 = vpop.permute.xlu0 %2907  ;;  %1887 = vmatpush.msra.mxu1 %v1786_v1 }
 0x5a7   : > { %v2910_v43 = vunpack.i.h.bf16 %v2908_v30  ;;  %v2909_v59 = vunpack.i.l.bf16 %v2908_v30  ;;  %1934 = vmatpush.msra.mxu0 %v2915_v44  ;;  %v1759_v4 = vsel %vm510_vm7, %v2919_v48, %v2920_v42 }
 0x5a8   : > { %1888 = vmatpush.msra.mxu1 %v1773_v63 }
 0x5a9   : > { %1935 = vmatpush.msra.mxu0 %v2910_v43  ;;  %v1772_v32 = vsel %vm522_vm6, %v2909_v59, %v2910_v43 }
 0x5aa   : > { %1889 = vmatpush.msra.mxu1 %v1772_v32 }
 0x5ab   : > { %1936 = vmatpush.msra.mxu0 %v2920_v42 }
 0x5ac   : > { %v2933_v34 = vpop.permute.xlu1 %2932  ;;  %1890 = vmatpush.msra.mxu1 %v1759_v4 }
 0x5ad   : > { %v2935_v7 = vunpack.i.h.bf16 %v2933_v34  ;;  %v2934_v24 = vunpack.i.l.bf16 %v2933_v34 }
 0x5ae   : > { %v2928_v0 = vpop.permute.xlu0 %2927 }
 0x5af   : > { %v2930_v3 = vunpack.i.h.bf16 %v2928_v0  ;;  %v2929_v61 = vunpack.i.l.bf16 %v2928_v0  ;;  %1962 = vmatpush.msrb.mxu2 %v2935_v7  ;;  %v1856_v23 = vsel %vm612_vm0, %v2934_v24, %v2935_v7 }
 0x5b0   : > { %1916 = vmatpush.msra.mxu3 %v1856_v23  ;;  %2461 = vmatmul.msk.f32.vlgmr.msrb.gmra.mxu2 %vm921_vm15, %v1741_v55 }
 0x5b1   : > { %1937 = vmatpush.msra.mxu0 %v2930_v3  ;;  %v1758_v54 = vsel %vm510_vm7, %v2929_v61, %v2930_v3  ;;  %2459 = vmatmul.msk.f32.vlgmr.msra.gmra.mxu3 %vm921_vm15, %v1741_v55 }
 0x5b2   : > { %1891 = vmatpush.msra.mxu1 %v1758_v54 }
 0x5b3   : > { %1938 = vmatpush.msra.mxu0 %v3906_v8  ;;  %v1742_v8 = vld [vmem:[%s4148_s9 + $0x10] sm:$0xff] }
 0x5b4   : > { %1892 = vmatpush.msra.mxu1 %v3909_v33 }
 0x5b5   : > { %1939 = vmatpush.msra.mxu0 %v3894_v40 }
 0x5b6   : > { %1893 = vmatpush.msra.mxu1 %v3897_v28  ;;  %1940 = vmatmul.f32.vlgmr.msra.gmra.mxu0 %v1740_v46  ;;  %v1865_v33 = vpop.permute.xlu0 %1864 }
 0x5b7   : > { %1894 = vmatmul.f32.vlgmr.msra.gmra.mxu1 %v1740_v46 }
 0x5b8   : > { %2462 = vmatmul.msk.f32.gmra.mxu2 %vm921_vm15, %v1743_v58 }
 0x5b9   : > { %2460 = vmatmul.msk.f32.gmra.mxu3 %vm921_vm15, %v1743_v58 }
 0x5be   : > { %1943 = vmatmul.f32.gmra.mxu0 %v1742_v8 }
 0x5bf   : > { %1897 = vmatmul.f32.gmra.mxu1 %v1742_v8 }
 0x633   : > { %v1941_v40 = vpop.f32.mrf.mxu0  ;;  %v1964_v2 = vpop.f32.mrf.mxu2 }
 0x634   : > { %v1942_v47 = vadd.f32 %v1941_v40, %v1865_v33  ;;  %v1895_v9 = vpop.f32.mrf.mxu1  ;;  %v1918_v57 = vpop.f32.mrf.mxu3 }
 0x635   : > { %v1896_v5 = vadd.f32 %v1895_v9, %v1865_v33 }
 0x636   : > { %v1965_v28 = vadd.f32 %v1964_v2, %v1942_v47 }
 0x637   : > { %v1919_v52 = vadd.f32 %v1918_v57, %v1896_v5 }
 0x638   : > { %vm1971_vm10 = vcmp.ge.f32.partialorder %v1965_v28, 0.0  ;;  %v1975_v60 = vmul.f32 0.2, %v1965_v28 }
 0x639   : > { %vm1970_vm11 = vcmp.ge.f32.partialorder %v1919_v52, 0.0  ;;  %v1974_v10 = vmul.f32 0.2, %v1919_v52 }
 0x63a   : > { %v1979_v12 = vsel %vm1971_vm10, %v1965_v28, %v1975_v60 }
 0x63b   : > { %v3988_v14 = vadd.f32 %v1979_v12, %v3938_v6  ;;  %v1978_v15 = vsel %vm1970_vm11, %v1919_v52, %v1974_v10  ;;  %v1944_v19 = vpop.f32.mrf.mxu0  ;;  %v1967_v20 = vpop.f32.mrf.mxu2 }
 0x63c   : > { %v3991_v18 = vadd.f32 %v1978_v15, %v3957_v56  ;;  %v1945_v50 = vadd.f32 %v1944_v19, %v1870_v11  ;;  %v1898_v22 = vpop.f32.mrf.mxu1  ;;  %v1921_v37 = vpop.f32.mrf.mxu3 }
 0x63d   : > { %v1899_v38 = vadd.f32 %v1898_v22, %v1870_v11 }
 0x63e   : > { %v1968_v21 = vadd.f32 %v1967_v20, %v1945_v50  ;;  %v2946_v29 = vpack.i.bf16 %v3988_v14, %v3991_v18 }
 0x63f   : > { %v1922_v16 = vadd.f32 %v1921_v37, %v1899_v38 }
 0x640   : > { %vm1973_vm12 = vcmp.ge.f32.partialorder %v1968_v21, 0.0  ;;  %v1977_v27 = vmul.f32 0.2, %v1968_v21  ;;  %2947 = vrot.lane.b32.xlu0 %v2946_v29, %s3087_s27  ;;  %2942 = vrot.lane.b32.xlu1 %v2946_v29, %s3086_s26 }
 0x641   : > { %vm1972_vm13 = vcmp.ge.f32.partialorder %v1922_v16, 0.0  ;;  %v1976_v6 = vmul.f32 0.2, %v1922_v16  ;;  %2937 = vrot.lane.b32.xlu2 %v2946_v29, %s3084_s24 }
 0x642   : > { %v1981_v51 = vsel %vm1973_vm12, %v1968_v21, %v1977_v27 }
 0x643   : > { %v3999_v41 = vadd.f32 %v1981_v51, %v3941_v53  ;;  %v1980_v13 = vsel %vm1972_vm13, %v1922_v16, %v1976_v6  ;;  %v1991_v53 = vld [vmem:[%s4151_s12 + $0x8] sm:$0xff] }
 0x644   : > { %v4002_v31 = vadd.f32 %v1980_v13, %v3951_v26 }
 0x646   : > { %v2956_v25 = vpack.i.bf16 %v3999_v41, %v4002_v31 }
 0x648   : > { %2957 = vrot.lane.b32.xlu0 %v2956_v25, %s3086_s26  ;;  %2952 = vrot.lane.b32.xlu1 %v2956_v25, %s3084_s24 }
 0x649   : > { %2044 = vrot.lane.b32.xlu2 %v3999_v41, %s3088_s28 }
 0x650   : > { %2038 = vrot.lane.b32.xlu0 %v3991_v18, %s3088_s28  ;;  %2040 = vrot.lane.b32.xlu1 %v3988_v14, %s3088_s28 }
 0x651   : > { %2967 = vrot.lane.b32.xlu2 %v2956_v25, %s3087_s27 }
 0x658   : > { %2962 = vrot.lane.b32.xlu0 %v2946_v29, %s3089_s29  ;;  %2042 = vrot.lane.b32.xlu1 %v4002_v31, %s3088_s28 }
 0x659   : > { %2972 = vrot.lane.b32.xlu2 %v2956_v25, %s3089_s29 }
 0x660   : > { %2987 = vrot.lane.b32.xlu0 %v2956_v25, %s4157_s16  ;;  %2982 = vrot.lane.b32.xlu1 %v2956_v25, %s3090_s30 }
 0x661   : > { %2977 = vrot.lane.b32.xlu2 %v2946_v29, %s3090_s30 }
 0x668   : > { %3002 = vrot.lane.b32.xlu0 %v2946_v29, %s4158_s25  ;;  %2992 = vrot.lane.b32.xlu1 %v2946_v29, %s4157_s16 }
 0x669   : > { %2997 = vrot.lane.b32.xlu2 %v2956_v25, %s4158_s25 }
 0x670   : > { %2115 = vperm.xlu1 %2558, %v1991_v53  }
 0x671   : > { %2110 = vperm.xlu2 %2559, %v1990_v62  }
 0x69b   : > { %v2938_v49 = vpop.permute.xlu2 %2937 }
 0x69c   : > { %v2940_v36 = vunpack.i.h.bf16 %v2938_v49  ;;  %v2939_v1 = vunpack.i.l.bf16 %v2938_v49  ;;  %v1987_v49 = vld [vmem:[%s4150_s11 + $0x8] sm:$0xff] }
 0x69e   : > { %v2088_v34 = vsel %vm597_vm1, %v2939_v1, %v2940_v36 }
 0x6a3   : > { %v4031_v26 = vpop.permute.xlu2 %2044 }
 0x6ab   : > { %v2968_v35 = vpop.permute.xlu2 %2967 }
 0x6ac   : > { %v2970_v7 = vunpack.i.h.bf16 %v2968_v35  ;;  %v2969_v24 = vunpack.i.l.bf16 %v2968_v35 }
 0x6ae   : > { %v2061_v33 = vsel %vm567_vm3, %v2969_v24, %v2970_v7 }
 0x6b2   : > { %v2948_v39 = vpop.permute.xlu0 %2947  ;;  %v2943_v56 = vpop.permute.xlu1 %2942 }
 0x6b3   : > { %v2973_v44 = vpop.permute.xlu2 %2972  ;;  %v2945_v32 = vunpack.i.h.bf16 %v2943_v56  ;;  %v2944_v4 = vunpack.i.l.bf16 %v2943_v56  ;;  %v2950_v61 = vunpack.i.h.bf16 %v2948_v39  ;;  %v2949_v23 = vunpack.i.l.bf16 %v2948_v39  ;;  %v1986_v56 = vld [vmem:[%s4150_s11] sm:$0xff] }
 0x6b4   : > { %v2975_v57 = vunpack.i.h.bf16 %v2973_v44  ;;  %v2974_v5 = vunpack.i.l.bf16 %v2973_v44  ;;  %v1988_v44 = vld [vmem:[%s4150_s11 + $0x10] sm:$0xff] }
 0x6b5   : > { %v2074_v46 = vsel %vm582_vm2, %v2944_v4, %v2945_v32  ;;  %v2060_v2 = vsel %vm567_vm3, %v2949_v23, %v2950_v61 }
 0x6b6   : > { %v2033_v11 = vsel %vm537_vm5, %v2974_v5, %v2975_v57 }
 0x6ba   : > { %v2958_v45 = vpop.permute.xlu0 %2957  ;;  %v2953_v17 = vpop.permute.xlu1 %2952 }
 0x6bb   : > { %v2955_v30 = vunpack.i.h.bf16 %v2953_v17  ;;  %v2954_v63 = vunpack.i.l.bf16 %v2953_v17  ;;  %v4033_v42 = vpop.permute.xlu2 %2977  ;;  %v2960_v48 = vunpack.i.h.bf16 %v2958_v45  ;;  %v2959_v43 = vunpack.i.l.bf16 %v2958_v45 }
 0x6bc   : > { %v2980_v20 = vunpack.i.h.bf16 %v4033_v42  ;;  %v2979_v50 = vunpack.i.l.bf16 %v4033_v42 }
 0x6bd   : > { %2170 = vmatpush.msra.mxu2 %v2955_v30  ;;  %v2089_v59 = vsel %vm597_vm1, %v2954_v63, %v2955_v30  ;;  %v2075_v55 = vsel %vm582_vm2, %v2959_v43, %v2960_v48 }
 0x6be   : > { %2124 = vmatpush.msrb.mxu3 %v2089_v59  ;;  %v2018_v16 = vsel %vm522_vm6, %v2979_v50, %v2980_v20 }
 0x6bf   : > { %2171 = vmatpush.msra.mxu2 %v2940_v36 }
 0x6c0   : > { %2125 = vmatpush.msrb.mxu3 %v2088_v34 }
 0x6c1   : > { %2172 = vmatpush.msra.mxu2 %v2960_v48 }
 0x6c2   : > { %v2039_v0 = vpop.permute.xlu0 %2038  ;;  %v4038_v3 = vpop.permute.xlu1 %2040  ;;  %2126 = vmatpush.msrb.mxu3 %v2075_v55 }
 0x6c3   : > { %v2998_v54 = vpop.permute.xlu2 %2997  ;;  %2173 = vmatpush.msra.mxu2 %v2945_v32  ;;  %v4053_v10 = vsel %vm552_vm4, %v2039_v0, %v4038_v3 }
 0x6c4   : > { %v3000_v58 = vunpack.i.h.bf16 %v2998_v54  ;;  %v2999_v8 = vunpack.i.l.bf16 %v2998_v54  ;;  %2127 = vmatpush.msrb.mxu3 %v2074_v46 }
 0x6c5   : > { %2174 = vmatpush.msra.mxu2 %v2970_v7 }
 0x6c6   : > { %2207 = vmatpush.msrb.mxu0 %v3000_v58  ;;  %2128 = vmatpush.msrb.mxu3 %v2061_v33  ;;  %v2103_v40 = vsel %vm612_vm0, %v2999_v8, %v3000_v58 }
 0x6c7   : > { %2161 = vmatpush.msrb.mxu1 %v2103_v40  ;;  %2175 = vmatpush.msra.mxu2 %v2950_v61 }
 0x6c8   : > { %2129 = vmatpush.msrb.mxu3 %v2060_v2 }
 0x6c9   : > { %2176 = vmatpush.msra.mxu2 %v4031_v26 }
 0x6ca   : > { %v2963_v47 = vpop.permute.xlu0 %2962  ;;  %v2043_v9 = vpop.permute.xlu1 %2042 }
 0x6cb   : > { %2177 = vmatpush.msra.mxu2 %v4038_v3  ;;  %v4048_v28 = vsel %vm552_vm4, %v2043_v9, %v4031_v26  ;;  %v2965_v52 = vunpack.i.h.bf16 %v2963_v47  ;;  %v2964_v60 = vunpack.i.l.bf16 %v2963_v47  ;;  %v2111_v45 = vpop.permute.xlu2 %2110 }
 0x6cc   : > { %2130 = vmatpush.msrb.mxu3 %v4048_v28 }
 0x6cd   : > { %2178 = vmatpush.msra.mxu2 %v2975_v57  ;;  %v2032_v12 = vsel %vm537_vm5, %v2964_v60, %v2965_v52  ;;  %v2233_v57 = vld [vmem:[%s4153_s14] sm:$0x3] }
 0x6ce   : > { %2131 = vmatpush.msrb.mxu3 %v4053_v10 }
 0x6cf   : > { %2179 = vmatpush.msra.mxu2 %v2965_v52 }
 0x6d0   : > { %2132 = vmatpush.msrb.mxu3 %v2033_v11 }
 0x6d2   : > { %v2988_v15 = vpop.permute.xlu0 %2987  ;;  %v2983_v19 = vpop.permute.xlu1 %2982  ;;  %2133 = vmatpush.msrb.mxu3 %v2032_v12 }
 0x6d3   : > { %v2985_v22 = vunpack.i.h.bf16 %v2983_v19  ;;  %v2984_v37 = vunpack.i.l.bf16 %v2983_v19  ;;  %v2990_v38 = vunpack.i.h.bf16 %v2988_v15  ;;  %v2989_v21 = vunpack.i.l.bf16 %v2988_v15 }
 0x6d5   : > { %2180 = vmatpush.msra.mxu2 %v2985_v22  ;;  %v2019_v29 = vsel %vm522_vm6, %v2984_v37, %v2985_v22  ;;  %v2005_v27 = vsel %vm510_vm7, %v2989_v21, %v2990_v38 }
 0x6d6   : > { %2134 = vmatpush.msrb.mxu3 %v2019_v29 }
 0x6d7   : > { %2181 = vmatpush.msra.mxu2 %v2980_v20 }
 0x6d8   : > { %2135 = vmatpush.msrb.mxu3 %v2018_v16 }
 0x6d9   : > { %2182 = vmatpush.msra.mxu2 %v2990_v38 }
 0x6da   : > { %v3003_v6 = vpop.permute.xlu0 %3002  ;;  %v2993_v51 = vpop.permute.xlu1 %2992  ;;  %2136 = vmatpush.msrb.mxu3 %v2005_v27 }
 0x6db   : > { %v3005_v13 = vunpack.i.h.bf16 %v3003_v6  ;;  %v3004_v25 = vunpack.i.l.bf16 %v3003_v6  ;;  %v2995_v53 = vunpack.i.h.bf16 %v2993_v51  ;;  %v2994_v62 = vunpack.i.l.bf16 %v2993_v51 }
 0x6dd   : > { %2183 = vmatpush.msra.mxu2 %v2995_v53  ;;  %2208 = vmatpush.msrb.mxu0 %v3005_v13  ;;  %v2004_v35 = vsel %vm510_vm7, %v2994_v62, %v2995_v53  ;;  %v2102_v39 = vsel %vm612_vm0, %v3004_v25, %v3005_v13 }
 0x6de   : > { %2137 = vmatpush.msrb.mxu3 %v2004_v35  ;;  %2162 = vmatpush.msrb.mxu1 %v2102_v39 }
 0x6df   : > { %2184 = vmatpush.msra.mxu2 %v3999_v41  ;;  %2465 = vmatmul.msk.f32.vlgmr.msrb.gmra.mxu0 %vm921_vm15, %v1987_v49  ;;  %v1989_v41 = vld [vmem:[%s4150_s11 + $0x18] sm:$0xff] }
 0x6e0   : > { %2138 = vmatpush.msrb.mxu3 %v4002_v31  ;;  %2463 = vmatmul.msk.f32.vlgmr.msrb.gmra.mxu1 %vm921_vm15, %v1987_v49 }
 0x6e1   : > { %2185 = vmatpush.msra.mxu2 %v3988_v14 }
 0x6e2   : > { %2139 = vmatpush.msrb.mxu3 %v3991_v18  ;;  %2186 = vmatmul.f32.vlgmr.msra.gmra.mxu2 %v1986_v56  ;;  %v2116_v43 = vpop.permute.xlu1 %2115 }
 0x6e3   : > { %2140 = vmatmul.f32.vlgmr.msrb.gmra.mxu3 %v1986_v56 }
 0x6e7   : > { %2466 = vmatmul.msk.f32.gmra.mxu0 %vm921_vm15, %v1989_v41 }
 0x6e8   : > { %2464 = vmatmul.msk.f32.gmra.mxu1 %vm921_vm15, %v1989_v41 }
 0x6ea   : > { %2189 = vmatmul.f32.gmra.mxu2 %v1988_v44 }
 0x6eb   : > { %2143 = vmatmul.f32.gmra.mxu3 %v1988_v44 }
 0x75c   : > { %v2210_v31 = vpop.f32.mrf.mxu0 }
 0x75d   : > { %v2164_v14 = vpop.f32.mrf.mxu1 }
 0x764   : > { %v2213_v7 = vpop.f32.mrf.mxu0 }
 0x765   : > { %v2187_v18 = vpop.f32.mrf.mxu2  ;;  %v2167_v61 = vpop.f32.mrf.mxu1 }
 0x766   : > { %v2188_v17 = vadd.f32 %v2187_v18, %v2111_v45  ;;  %v2141_v36 = vpop.f32.mrf.mxu3 }
 0x767   : > { %v2142_v1 = vadd.f32 %v2141_v36, %v2111_v45 }
 0x768   : > { %v2211_v30 = vadd.f32 %v2210_v31, %v2188_v17 }
 0x769   : > { %v2165_v63 = vadd.f32 %v2164_v14, %v2142_v1 }
 0x76a   : > { %vm2217_vm6 = vcmp.ge.f32.partialorder %v2211_v30, 0.0  ;;  %v2221_v42 = vmul.f32 0.2, %v2211_v30 }
 0x76b   : > { %vm2216_vm7 = vcmp.ge.f32.partialorder %v2165_v63, 0.0  ;;  %v2220_v48 = vmul.f32 0.2, %v2165_v63 }
 0x76c   : > { %v2225_v59 = vsel %vm2217_vm6, %v2211_v30, %v2221_v42 }
 0x76d   : > { %v2229_v32 = vadd.f32 %v2225_v59, %v4038_v3  ;;  %v2224_v4 = vsel %vm2216_vm7, %v2165_v63, %v2220_v48  ;;  %v2190_v34 = vpop.f32.mrf.mxu2 }
 0x76e   : > { %v4087_v24 = vadd.f32 %v2224_v4, %v4053_v10  ;;  %v2191_v55 = vadd.f32 %v2190_v34, %v2116_v43  ;;  %v2144_v0 = vpop.f32.mrf.mxu3  ;;  %v2232_v10 = vld [vmem:[%s4152_s13] sm:$0xf] }
 0x76f   : > { %v2145_v23 = vadd.f32 %v2144_v0, %v2116_v43  ;;  %2328 = vst [vmem:[#allocation1] ss:$4 sm:$0xff] %v2232_v10 }
 0x770   : > { %v2214_v54 = vadd.f32 %v2213_v7, %v2191_v55  ;;  %v3006_v46 = vpack.i.bf16 %v2229_v32, %v4087_v24 }
 0x771   : > { %v2168_v58 = vadd.f32 %v2167_v61, %v2145_v23 }
 0x772   : > { %vm2219_vm14 = vcmp.ge.f32.partialorder %v2214_v54, 0.0  ;;  %v2223_v8 = vmul.f32 0.2, %v2214_v54  ;;  %3007 = vrot.lane.b32.xlu1 %v3006_v46, %s3084_s24 }
 0x773   : > { %vm2218_vm8 = vcmp.ge.f32.partialorder %v2168_v58, 0.0  ;;  %v2222_v3 = vmul.f32 0.2, %v2168_v58 }
 0x774   : > { %v2227_v33 = vsel %vm2219_vm14, %v2214_v54, %v2223_v8 }
 0x775   : > { %v2231_v40 = vadd.f32 %v2227_v33, %v4031_v26  ;;  %v2226_v2 = vsel %vm2218_vm8, %v2168_v58, %v2222_v3 }
 0x776   : > { %v4093_v47 = vadd.f32 %v2226_v2, %v4048_v28  ;;  %v2330_v61 = vld.sshfl [vmem:[#allocation1 + $0x8] sm:$0xff pattern:$0x73625140]  ;;  %v2329_v33 = vld.sshfl [vmem:[#allocation1] sm:$0xff pattern:$0x73625140] }
 0x778   : > { %v3021_v9 = vpack.i.bf16 %v2231_v40, %v4093_v47  ;;  %v3056_v26 = vpack.i.bf16 %v4087_v24, %v4093_v47 }
 0x77a   : > { %3022 = vrot.lane.b32.xlu2 %v3021_v9, %s3086_s26  ;;  %3012 = vrot.lane.b32.xlu0 %v3021_v9, %s3084_s24 }
 0x77b   : > { %3032 = vrot.lane.b32.xlu1 %v3021_v9, %s3087_s27 }
 0x782   : > { %3027 = vrot.lane.b32.xlu2 %v3006_v46, %s3087_s27  ;;  %3017 = vrot.lane.b32.xlu0 %v3006_v46, %s3086_s26  ;;  %s4159_s26 = smov 127  }
 0x783   : > { %3037 = vrot.lane.b32.xlu1 %v3006_v46, %s3088_s28 }
 0x78a   : > { %3052 = vrot.lane.b32.xlu2 %v3021_v9, %s3089_s29  ;;  %3042 = vrot.lane.b32.xlu0 %v3021_v9, %s3088_s28 }
 0x78b   : > { %3057 = vrot.lane.b32.xlu1 %v3056_v26, %s3090_s30 }
 0x792   : > { %3062 = vrot.lane.b32.xlu2 %v3021_v9, %s4158_s25  ;;  %3047 = vrot.lane.b32.xlu0 %v3006_v46, %s3089_s29  ;;  %s2436_s29 = sshll.u32 %s4161_s19, 1 }
 0x793   : > { %3072 = vrot.lane.b32.xlu1 %v3006_v46, %s4158_s25  ;;  %s492_s20 = scalar_lea.vmem %s4154_s15, %s2436_s29 }
 0x79a   : > { %2324 = vperm.xlu2 %2559, %v2233_v57   ;;  %3067 = vrot.lane.b32.xlu0 %v3056_v26, %s4159_s26 }
 0x7d4   : > { %v3023_v5 = vpop.permute.xlu2 %3022 }
 0x7d5   : > { %v3025_v21 = vunpack.i.h.bf16 %v3023_v5  ;;  %v3024_v29 = vunpack.i.l.bf16 %v3023_v5 }
 0x7d7   : > { %v2295_v51 = vsel %vm582_vm2, %v3024_v29, %v3025_v21 }
 0x7dc   : > { %v3028_v28 = vpop.permute.xlu2 %3027 }
 0x7dd   : > { %v3030_v39 = vunpack.i.h.bf16 %v3028_v28  ;;  %v3029_v56 = vunpack.i.l.bf16 %v3028_v28 }
 0x7df   : > { %v2282_v31 = vsel %vm567_vm3, %v3029_v56, %v3030_v39 }
 0x7e4   : > { %v3053_v52 = vpop.permute.xlu2 %3052  ;;  %v3008_v60 = vpop.permute.xlu1 %3007 }
 0x7e5   : > { %v3010_v11 = vunpack.i.h.bf16 %v3008_v60  ;;  %v3009_v12 = vunpack.i.l.bf16 %v3008_v60  ;;  %v3055_v30 = vunpack.i.h.bf16 %v3053_v52  ;;  %v3054_v63 = vunpack.i.l.bf16 %v3053_v52 }
 0x7e7   : > { %v2306_v6 = vsel %vm597_vm1, %v3009_v12, %v3010_v11  ;;  %v2259_v43 = vsel %vm537_vm5, %v3054_v63, %v3055_v30 }
 0x7ec   : > { %v3013_v15 = vpop.permute.xlu0 %3012  ;;  %v3063_v19 = vpop.permute.xlu2 %3062 }
 0x7ed   : > { %v3015_v20 = vunpack.i.h.bf16 %v3013_v15  ;;  %v3014_v50 = vunpack.i.l.bf16 %v3013_v15  ;;  %v3065_v22 = vunpack.i.h.bf16 %v3063_v19  ;;  %v3064_v37 = vunpack.i.l.bf16 %v3063_v19  ;;  %v3033_v38 = vpop.permute.xlu1 %3032 }
 0x7ee   : > { %v3035_v25 = vunpack.i.h.bf16 %v3033_v38  ;;  %v3034_v53 = vunpack.i.l.bf16 %v3033_v38 }
 0x7ef   : > { %v2307_v16 = vsel %vm597_vm1, %v3014_v50, %v3015_v20  ;;  %v2319_v27 = vsel %vm612_vm0, %v3064_v37, %v3065_v22 }
 0x7f0   : > { %2334 = vmatpush.msra.mxu1 %v2307_v16  ;;  %2368 = vmatpush.msra.mxu3 %v2319_v27  ;;  %v2283_v44 = vsel %vm567_vm3, %v3034_v53, %v3035_v25 }
 0x7f2   : > { %2335 = vmatpush.msra.mxu1 %v2306_v6 }
 0x7f4   : > { %v3018_v13 = vpop.permute.xlu0 %3017  ;;  %2336 = vmatpush.msra.mxu1 %v2295_v51  ;;  %v2325_v40 = vpop.permute.xlu2 %2324 }
 0x7f5   : > { %v3020_v62 = vunpack.i.h.bf16 %v3018_v13  ;;  %v3019_v49 = vunpack.i.l.bf16 %v3018_v13  ;;  %v3038_v35 = vpop.permute.xlu1 %3037 }
 0x7f6   : > { %v3040_v45 = vunpack.i.h.bf16 %v3038_v35  ;;  %v3039_v18 = vunpack.i.l.bf16 %v3038_v35 }
 0x7f7   : > { %v2294_v41 = vsel %vm582_vm2, %v3019_v49, %v3020_v62 }
 0x7f8   : > { %2337 = vmatpush.msra.mxu1 %v2294_v41  ;;  %v2270_v48 = vsel %vm552_vm4, %v3039_v18, %v3040_v45 }
 0x7fa   : > { %2338 = vmatpush.msra.mxu1 %v2283_v44 }
 0x7fc   : > { %v3043_v14 = vpop.permute.xlu0 %3042  ;;  %2339 = vmatpush.msra.mxu1 %v2282_v31 }
 0x7fd   : > { %v3045_v17 = vunpack.i.h.bf16 %v3043_v14  ;;  %v3044_v36 = vunpack.i.l.bf16 %v3043_v14  ;;  %v3058_v1 = vpop.permute.xlu1 %3057 }
 0x7fe   : > { %v3059_v23 = vunpack.i.l.bf16 %v3058_v1  ;;  %v3060_v46 = vunpack.i.h.bf16 %v3058_v1 }
 0x7ff   : > { %v2271_v42 = vsel %vm552_vm4, %v3044_v36, %v3045_v17 }
 0x800   : > { %2340 = vmatpush.msra.mxu1 %v2271_v42 }
 0x802   : > { %2341 = vmatpush.msra.mxu1 %v2270_v48 }
 0x804   : > { %v3048_v59 = vpop.permute.xlu0 %3047  ;;  %2342 = vmatpush.msra.mxu1 %v2259_v43 }
 0x805   : > { %v3050_v32 = vunpack.i.h.bf16 %v3048_v59  ;;  %v3049_v4 = vunpack.i.l.bf16 %v3048_v59  ;;  %v3073_v34 = vpop.permute.xlu1 %3072 }
 0x806   : > { %v3075_v7 = vunpack.i.h.bf16 %v3073_v34  ;;  %v3074_v55 = vunpack.i.l.bf16 %v3073_v34 }
 0x807   : > { %v2258_v0 = vsel %vm537_vm5, %v3049_v4, %v3050_v32 }
 0x808   : > { %2343 = vmatpush.msra.mxu1 %v2258_v0  ;;  %v2318_v54 = vsel %vm612_vm0, %v3074_v55, %v3075_v7  ;;  %vm2374_vm0 = vcmask 975872  }
 0x809   : > { %2369 = vmatpush.msra.mxu3 %v2318_v54 }
 0x80a   : > { %2344 = vmatpush.msra.mxu1 %v3059_v23  ;;  %2467 = vmatmul.msk.f32.vlgmr.msra.gmra.mxu3 %vm921_vm15, %v2330_v61 }
 0x80c   : > { %v3068_v58 = vpop.permute.xlu0 %3067  ;;  %2345 = vmatpush.msra.mxu1 %v3060_v46 }
 0x80d   : > { %v3069_v8 = vunpack.i.l.bf16 %v3068_v58  ;;  %v3070_v3 = vunpack.i.h.bf16 %v3068_v58 }
 0x80f   : > { %2346 = vmatpush.msra.mxu1 %v3069_v8 }
 0x811   : > { %2347 = vmatpush.msra.mxu1 %v3070_v3 }
 0x813   : > { %2348 = vmatpush.msra.mxu1 %v4093_v47 }
 0x815   : > { %2349 = vmatpush.msra.mxu1 %v4087_v24 }
 0x816   : > { %2350 = vmatmul.f32.vlgmr.msra.gmra.mxu1 %v2329_v33 }
 0x88d   : > { %v2371_v9 = vpop.f32.mrf.mxu3 }
 0x893   : > { %v2351_v2 = vpop.f32.mrf.mxu1 }
 0x894   : > { %v2352_v26 = vadd.f32 %v2351_v2, %v2325_v40 }
 0x896   : > { %v2372_v57 = vadd.f32 %v2371_v9, %v2352_v26 }
 0x898   : > { %2375 = vst.msk [vmem:[%s492_s20] sm:$0x3] %vm2374_vm0, %v2372_v57 }
 0x899 PF: > { %s25_s18 = sadd.s32 1, %s3082_s18  }
 0x89a   : > { %p22_p4 = scmp.ge.s32.totalorder %s25_s18, 4  }
 0x89c   :  { %24 = sbr.rel (!%p22_p4) target bundleno = 1 (0x1), region = 110 }

</bundles_post_ra>
